<compile_context>
chip_gen: v6e
topology: v6e:2x2x1
jax: 0.10.0
libtpu: 0.0.40
codegen_flags: <defaults>
</compile_context>

<pallas_src>
import jax
import jax.numpy as jnp
import numpy as np
from jax.experimental import pallas as pl
from jax.experimental.pallas import tpu as pltpu

# ---------------- config ----------------
SIGMOID_EXPONENT = 2.0
BETA = 0.9
BIAS_INIT = 0.1
RANDOM_NOISE = 0.1

V, D, R, S, AS = 50, 16, 8, 6, 2
SA = S + AS                       # 8
B, L = 8, 8                       # batch = 8 so per-step row slices are sublane-aligned
LB = L * B

# ---- packed-parameter slab layout (row offsets kept multiples of 8) ----
ROW_ERG = 0                       # (D, R)          rows  0..15
ROW_WRS12 = ROW_ERG + D           # (R, 2*SA)       rows 16..23   [Wrs1 | Wrs2]
ROW_WSS12 = ROW_WRS12 + R         # (SA, 2*SA)      rows 24..31   [Wss1 | Wss2]
ROW_TR1WC = ROW_WSS12 + SA        # (SA, R+SA)      rows 32..39   [trans_r_1 | wildcard]
ROW_TR2T = ROW_TR1WC + SA         # (R, SA)         rows 40..47   trans_r_2.T
ROW_VEC = ROW_TR2T + R            # beta / bs12 / h0 / h1   rows 48..51
P_ROWS = 56
P_COLS = 2 * SA                   # 16


def farnn_kernel(emb_ref, regex_ref, p_ref, out_ref):
    # ---- unpack parameter slab (static slices; loaded once) ----
    erg = p_ref[ROW_ERG:ROW_ERG + D, 0:R]                 # (D, R)
    wrs12 = p_ref[ROW_WRS12:ROW_WRS12 + R, 0:2 * SA]      # (R, 2*SA)
    wss12 = p_ref[ROW_WSS12:ROW_WSS12 + SA, 0:2 * SA]     # (SA, 2*SA)
    tr1wc = p_ref[ROW_TR1WC:ROW_TR1WC + SA, 0:R + SA]     # (SA, R+SA)
    tr2t = p_ref[ROW_TR2T:ROW_TR2T + R, 0:SA]             # (R, SA)
    beta = p_ref[ROW_VEC + 0:ROW_VEC + 1, 0:R]            # (1, R)
    bs12 = p_ref[ROW_VEC + 1:ROW_VEC + 2, 0:2 * SA]       # (1, 2*SA)   [bs1 | bs2]
    h0 = p_ref[ROW_VEC + 2:ROW_VEC + 3, 0:SA]             # (1, SA)
    h1 = p_ref[ROW_VEC + 3:ROW_VEC + 4, 0:SA]             # (1, SA)

    emb = emb_ref[...]            # (L*B, D)  time-major rows: t*B + b
    regex = regex_ref[...]        # (L*B, R)

    # ---- hoisted token-only work: dense matmuls over all L*B rows ----
    l_gen = jnp.tanh(jnp.dot(emb, erg, preferred_element_type=jnp.float32))
    l_all = regex * beta + l_gen * (1.0 - beta)                         # (L*B, R)
    gate_l_all = jnp.dot(l_all, wrs12,
                         preferred_element_type=jnp.float32) + bs12    # (L*B, 2*SA)

    # broadcasts hoisted out of the loop (JAX does not CSE broadcast_in_dim)
    h1b = jnp.broadcast_to(h1, (B, SA))
    hidden = jnp.broadcast_to(h0, (B, SA))

    # ---- fully unrolled serial recurrence (L is small and static) ----
    for t in range(L):
        lo = t * B
        l_vec = l_all[lo:lo + B, :]                     # (B, R)
        gate_l = gate_l_all[lo:lo + B, :]               # (B, 2*SA)

        # fused GRU gates: sigmoid(exponent*(hidden@[Wss1|Wss2] + l@[Wrs1|Wrs2] + [bs1|bs2]))
        gates = jax.nn.sigmoid(SIGMOID_EXPONENT * (
            jnp.dot(hidden, wss12, preferred_element_type=jnp.float32) + gate_l))
        zt = gates[:, :SA]
        rt = gates[:, SA:]

        hidden_bar = (1.0 - rt) * h1b + rt * hidden

        # fused projection: hidden_bar @ [trans_r_1 | wildcard]  ->  r_vec, hidden_wildcard
        proj = jnp.dot(hidden_bar, tr1wc, preferred_element_type=jnp.float32)  # (B, R+SA)
        r_vec = proj[:, :R]
        h_wild = proj[:, R:]

        hidden_cand = jnp.maximum(                       # clip_neg
            jnp.dot(l_vec * r_vec, tr2t, preferred_element_type=jnp.float32) + h_wild,
            0.0)

        hidden = (1.0 - zt) * hidden + zt * hidden_cand
        out_ref[lo:lo + B, :] = hidden


def _pack_params(erg, beta2d, h0_2d, h1_2d, wss1, wrs1, bs1, wss2, wrs2, bs2,
                 tr1, tr2, wc):
    wss12 = jnp.concatenate([wss1, wss2], axis=1)        # (SA, 2*SA)
    wrs12 = jnp.concatenate([wrs1, wrs2], axis=1)        # (R, 2*SA)
    bs12 = jnp.concatenate([bs1, bs2], axis=1)           # (1, 2*SA)
    tr1wc = jnp.concatenate([tr1, wc], axis=1)           # (SA, R+SA)

    slab = jnp.zeros((P_ROWS, P_COLS), jnp.float32)

    def put(s, a, row):
        r, c = a.shape
        return s.at[row:row + r, 0:c].set(a.astype(jnp.float32))

    slab = put(slab, erg, ROW_ERG)
    slab = put(slab, wrs12, ROW_WRS12)
    slab = put(slab, wss12, ROW_WSS12)
    slab = put(slab, tr1wc, ROW_TR1WC)
    slab = put(slab, tr2.T, ROW_TR2T)
    slab = put(slab, beta2d, ROW_VEC + 0)
    slab = put(slab, bs12, ROW_VEC + 1)
    slab = put(slab, h0_2d, ROW_VEC + 2)
    slab = put(slab, h1_2d, ROW_VEC + 3)
    return slab


@jax.jit
def farnn_forward(tokens, params):
    """tokens: (B, L) int32.  Returns all hidden states (B, L, S+AS) float32."""
    (embed_w, embed_r_w, erg, beta2d, h0_2d, h1_2d,
     wss1, wrs1, bs1, wss2, wrs2, bs2, tr1, tr2, wc) = params

    # plain-JAX glue: embedding gathers + time-major flatten (layout plumbing only)
    all_emb = embed_w[tokens]        # (B, L, D)
    all_regex = embed_r_w[tokens]    # (B, L, R)
    emb_flat = jnp.transpose(all_emb, (1, 0, 2)).reshape(LB, D).astype(jnp.float32)
    regex_flat = jnp.transpose(all_regex, (1, 0, 2)).reshape(LB, R).astype(jnp.float32)

    slab = _pack_params(erg, beta2d, h0_2d, h1_2d, wss1, wrs1, bs1,
                        wss2, wrs2, bs2, tr1, tr2, wc)

    out = pl.pallas_call(
        farnn_kernel,
        out_shape=jax.ShapeDtypeStruct((LB, SA), jnp.float32),
        grid=(1,),
        in_specs=[
            pl.BlockSpec((LB, D), lambda i: (0, 0)),
            pl.BlockSpec((LB, R), lambda i: (0, 0)),
            pl.BlockSpec((P_ROWS, P_COLS), lambda i: (0, 0)),
        ],
        out_specs=pl.BlockSpec((LB, SA), lambda i: (0, 0)),
        compiler_params=pltpu.CompilerParams(dimension_semantics=("arbitrary",)),
    )(emb_flat, regex_flat, slab)

    return jnp.transpose(out.reshape(L, B, SA), (1, 0, 2))   # (B, L, SA)


def reference_forward(tokens, params):
    """Pure-JAX reference mirroring the PyTorch forward (farnn=1)."""
    (embed_w, embed_r_w, erg, beta2d, h0_2d, h1_2d,
     wss1, wrs1, bs1, wss2, wrs2, bs2, tr1, tr2, wc) = params
    all_emb = embed_w[tokens].astype(jnp.float32)
    all_regex = embed_r_w[tokens].astype(jnp.float32)
    emb_seq = jnp.transpose(all_emb, (1, 0, 2))
    regex_seq = jnp.transpose(all_regex, (1, 0, 2))
    beta = beta2d[0]
    h0b = jnp.broadcast_to(h0_2d, (tokens.shape[0], SA))
    h1b = jnp.broadcast_to(h1_2d, (tokens.shape[0], SA))

    def step(hidden, xs):
        emb, regex = xs
        l_gen = jnp.tanh(emb @ erg)
        l_vec = regex * beta + l_gen * (1.0 - beta)
        zt = jax.nn.sigmoid(SIGMOID_EXPONENT * (hidden @ wss1 + l_vec @ wrs1 + bs1))
        rt = jax.nn.sigmoid(SIGMOID_EXPONENT * (hidden @ wss2 + l_vec @ wrs2 + bs2))
        hidden_bar = (1.0 - rt) * h1b + rt * hidden
        r_vec = hidden_bar @ tr1
        lr = l_vec * r_vec
        hidden_cand = lr @ tr2.T + hidden_bar @ wc
        hidden_cand = jnp.maximum(hidden_cand, 0.0)
        hidden_new = (1.0 - zt) * hidden + zt * hidden_cand
        return hidden_new, hidden_new

    _, allh = jax.lax.scan(step, h0b, (emb_seq, regex_seq))
    return jnp.transpose(allh, (1, 0, 2))


def make_params(key):
    ks = jax.random.split(key, 12)
    scale = 0.3
    embed_w = jax.random.normal(ks[0], (V, D), jnp.float32) * scale      # pretrained_embed
    embed_r_w = jax.random.normal(ks[1], (V, R), jnp.float32) * scale    # embed_r

    # embed_r_generalized = pinv(embedding) @ embed_r
    erg = jnp.linalg.pinv(embed_w) @ embed_r_w                           # (D, R)

    beta2d = jnp.full((1, R), BETA, jnp.float32)                         # beta_vec
    h0 = jnp.zeros((1, SA), jnp.float32).at[0, 0].set(1.0)               # hidden_init
    h1 = jax.random.normal(ks[2], (1, SA), jnp.float32) * scale          # h1 (ctor arg)

    wss1 = jax.random.normal(ks[3], (SA, SA), jnp.float32) * scale
    wrs1 = jax.random.normal(ks[4], (R, SA), jnp.float32) * scale
    bs1 = jnp.full((1, SA), BIAS_INIT, jnp.float32)
    wss2 = jax.random.normal(ks[5], (SA, SA), jnp.float32) * scale
    wrs2 = jax.random.normal(ks[6], (R, SA), jnp.float32) * scale
    bs2 = jnp.full((1, SA), BIAS_INIT, jnp.float32)

    # trans_r_1 / trans_r_2: (S, R) decomposition rows + AS noisy rows
    tr1 = jnp.concatenate(
        [jax.random.normal(ks[7], (S, R), jnp.float32) * scale,
         jax.random.normal(ks[8], (AS, R), jnp.float32) * RANDOM_NOISE], axis=0)
    tr2 = jnp.concatenate(
        [jax.random.normal(ks[9], (S, R), jnp.float32) * scale,
         jax.random.normal(ks[10], (AS, R), jnp.float32) * RANDOM_NOISE], axis=0)

    # trans_wildcard: noise (SA, SA) with top-left SxS replaced by wildcard transitions
    wc = jax.random.normal(ks[11], (SA, SA), jnp.float32) * RANDOM_NOISE
    wc = wc.at[:S, :S].set(
        jax.random.normal(jax.random.fold_in(key, 99), (S, S), jnp.float32) * scale)

    return (embed_w, embed_r_w, erg, beta2d, h0, h1,
            wss1, wrs1, bs1, wss2, wrs2, bs2, tr1, tr2, wc)


if __name__ == "__main__":
    key = jax.random.PRNGKey(0)
    pkey, tkey = jax.random.split(key)
    params = make_params(pkey)
    tokens = jax.random.randint(tkey, (B, L), 0, V, dtype=jnp.int32)
    lengths = jnp.full((B,), L, jnp.int32)  # lengths unused in the PyTorch forward

    out = jax.block_until_ready(farnn_forward(tokens, params))
    ref = jax.block_until_ready(reference_forward(tokens, params))

    assert out.shape == (B, L, SA), out.shape
    np.testing.assert_allclose(np.asarray(out), np.asarray(ref), atol=5e-5, rtol=5e-5)
    print("KERNEL_OK")
</pallas_src>

<mosaic_0001>
module attributes {stable_mosaic.version = 11 : i64} {
  func.func @farnn_kernel(%arg0: i32, %arg1: memref<64x16xf32, #tpu.memory_space<vmem>>, %arg2: memref<64x8xf32, #tpu.memory_space<vmem>>, %arg3: memref<56x16xf32, #tpu.memory_space<vmem>>, %arg4: memref<64x8xf32, #tpu.memory_space<vmem>>) attributes {dimension_semantics = [#tpu.dimension_semantics<arbitrary>], iteration_bounds = array<i64: 1>, scalar_prefetch = 0 : i64, scratch_operands = 0 : i64, tpu.core_type = #tpu.core_type<tc>, window_params = [{pipeline_mode = #tpu.pipeline_mode<synchronous>, transform_indices = @transform_0, window_bounds = array<i64: 64, 16>}, {pipeline_mode = #tpu.pipeline_mode<synchronous>, transform_indices = @transform_1, window_bounds = array<i64: 64, 8>}, {pipeline_mode = #tpu.pipeline_mode<synchronous>, transform_indices = @transform_2, window_bounds = array<i64: 56, 16>}, {pipeline_mode = #tpu.pipeline_mode<synchronous>, transform_indices = @transform_3, window_bounds = array<i64: 64, 8>}]} {
    %c0 = arith.constant 0 : index
    %c0_0 = arith.constant 0 : index
    %0 = vector.load %arg3[%c0, %c0_0] : memref<56x16xf32, #tpu.memory_space<vmem>>, vector<16x8xf32>
    %c16 = arith.constant 16 : index
    %c0_1 = arith.constant 0 : index
    %1 = vector.load %arg3[%c16, %c0_1] : memref<56x16xf32, #tpu.memory_space<vmem>>, vector<8x16xf32>
    %c24 = arith.constant 24 : index
    %c0_2 = arith.constant 0 : index
    %2 = vector.load %arg3[%c24, %c0_2] : memref<56x16xf32, #tpu.memory_space<vmem>>, vector<8x16xf32>
    %c32 = arith.constant 32 : index
    %c0_3 = arith.constant 0 : index
    %3 = vector.load %arg3[%c32, %c0_3] : memref<56x16xf32, #tpu.memory_space<vmem>>, vector<8x16xf32>
    %c40 = arith.constant 40 : index
    %c0_4 = arith.constant 0 : index
    %4 = vector.load %arg3[%c40, %c0_4] : memref<56x16xf32, #tpu.memory_space<vmem>>, vector<8x8xf32>
    %c48 = arith.constant 48 : index
    %c0_5 = arith.constant 0 : index
    %5 = vector.load %arg3[%c48, %c0_5] : memref<56x16xf32, #tpu.memory_space<vmem>>, vector<1x8xf32>
    %c49 = arith.constant 49 : index
    %c0_6 = arith.constant 0 : index
    %6 = vector.load %arg3[%c49, %c0_6] : memref<56x16xf32, #tpu.memory_space<vmem>>, vector<1x16xf32>
    %c50 = arith.constant 50 : index
    %c0_7 = arith.constant 0 : index
    %7 = vector.load %arg3[%c50, %c0_7] : memref<56x16xf32, #tpu.memory_space<vmem>>, vector<1x8xf32>
    %c51 = arith.constant 51 : index
    %c0_8 = arith.constant 0 : index
    %8 = vector.load %arg3[%c51, %c0_8] : memref<56x16xf32, #tpu.memory_space<vmem>>, vector<1x8xf32>
    %c0_9 = arith.constant 0 : index
    %c0_10 = arith.constant 0 : index
    %9 = vector.load %arg1[%c0_9, %c0_10] : memref<64x16xf32, #tpu.memory_space<vmem>>, vector<64x16xf32>
    %c0_11 = arith.constant 0 : index
    %c0_12 = arith.constant 0 : index
    %10 = vector.load %arg2[%c0_11, %c0_12] : memref<64x8xf32, #tpu.memory_space<vmem>>, vector<64x8xf32>
    %cst = arith.constant dense<0.000000e+00> : vector<64x8xf32>
    %11 = tpu.matmul %9, %0, %cst {dimension_numbers = #tpu.dot_dimension_numbers<[1], [0], [0], [1], [0, 0, 1, 1], [], []>} : vector<64x16xf32>, vector<16x8xf32>, vector<64x8xf32> -> vector<64x8xf32>
    %12 = math.tanh %11 : vector<64x8xf32>
    %13 = vector.broadcast %5 : vector<1x8xf32> to vector<64x8xf32>
    %14 = arith.mulf %10, %13 : vector<64x8xf32>
    %cst_13 = arith.constant 1.000000e+00 : f32
    %15 = vector.broadcast %cst_13 : f32 to vector<1x8xf32>
    %16 = arith.subf %15, %5 : vector<1x8xf32>
    %17 = vector.broadcast %16 : vector<1x8xf32> to vector<64x8xf32>
    %18 = arith.mulf %12, %17 : vector<64x8xf32>
    %19 = arith.addf %14, %18 : vector<64x8xf32>
    %cst_14 = arith.constant dense<0.000000e+00> : vector<64x16xf32>
    %20 = tpu.matmul %19, %1, %cst_14 {dimension_numbers = #tpu.dot_dimension_numbers<[1], [0], [0], [1], [0, 0, 1, 1], [], []>} : vector<64x8xf32>, vector<8x16xf32>, vector<64x16xf32> -> vector<64x16xf32>
    %21 = vector.broadcast %6 : vector<1x16xf32> to vector<64x16xf32>
    %22 = arith.addf %20, %21 : vector<64x16xf32>
    %23 = vector.shape_cast %8 : vector<1x8xf32> to vector<1x8xf32>
    %24 = vector.broadcast %23 : vector<1x8xf32> to vector<8x8xf32>
    %25 = vector.shape_cast %7 : vector<1x8xf32> to vector<1x8xf32>
    %26 = vector.broadcast %25 : vector<1x8xf32> to vector<8x8xf32>
    %27 = vector.extract_strided_slice %19 {offsets = [0, 0], sizes = [8, 8], strides = [1, 1]} : vector<64x8xf32> to vector<8x8xf32>
    %28 = vector.extract_strided_slice %22 {offsets = [0, 0], sizes = [8, 16], strides = [1, 1]} : vector<64x16xf32> to vector<8x16xf32>
    %cst_15 = arith.constant dense<0.000000e+00> : vector<8x16xf32>
    %29 = tpu.matmul %26, %2, %cst_15 {dimension_numbers = #tpu.dot_dimension_numbers<[1], [0], [0], [1], [0, 0, 1, 1], [], []>} : vector<8x8xf32>, vector<8x16xf32>, vector<8x16xf32> -> vector<8x16xf32>
    %30 = arith.addf %29, %28 : vector<8x16xf32>
    %cst_16 = arith.constant 2.000000e+00 : f32
    %31 = vector.broadcast %cst_16 : f32 to vector<8x16xf32>
    %32 = arith.mulf %31, %30 : vector<8x16xf32>
    %33 = arith.negf %32 : vector<8x16xf32>
    %34 = math.exp %33 : vector<8x16xf32>
    %cst_17 = arith.constant 1.000000e+00 : f32
    %35 = vector.broadcast %cst_17 : f32 to vector<8x16xf32>
    %36 = arith.addf %35, %34 : vector<8x16xf32>
    %37 = arith.divf %35, %36 : vector<8x16xf32>
    %38 = vector.extract_strided_slice %37 {offsets = [0, 0], sizes = [8, 8], strides = [1, 1]} : vector<8x16xf32> to vector<8x8xf32>
    %39 = vector.extract_strided_slice %37 {offsets = [0, 8], sizes = [8, 8], strides = [1, 1]} : vector<8x16xf32> to vector<8x8xf32>
    %cst_18 = arith.constant 1.000000e+00 : f32
    %40 = vector.broadcast %cst_18 : f32 to vector<8x8xf32>
    %41 = arith.subf %40, %39 : vector<8x8xf32>
    %42 = arith.mulf %41, %24 : vector<8x8xf32>
    %43 = arith.mulf %39, %26 : vector<8x8xf32>
    %44 = arith.addf %42, %43 : vector<8x8xf32>
    %cst_19 = arith.constant dense<0.000000e+00> : vector<8x16xf32>
    %45 = tpu.matmul %44, %3, %cst_19 {dimension_numbers = #tpu.dot_dimension_numbers<[1], [0], [0], [1], [0, 0, 1, 1], [], []>} : vector<8x8xf32>, vector<8x16xf32>, vector<8x16xf32> -> vector<8x16xf32>
    %46 = vector.extract_strided_slice %45 {offsets = [0, 0], sizes = [8, 8], strides = [1, 1]} : vector<8x16xf32> to vector<8x8xf32>
    %47 = vector.extract_strided_slice %45 {offsets = [0, 8], sizes = [8, 8], strides = [1, 1]} : vector<8x16xf32> to vector<8x8xf32>
    %48 = arith.mulf %27, %46 : vector<8x8xf32>
    %cst_20 = arith.constant dense<0.000000e+00> : vector<8x8xf32>
    %49 = tpu.matmul %48, %4, %cst_20 {dimension_numbers = #tpu.dot_dimension_numbers<[1], [0], [0], [1], [0, 0, 1, 1], [], []>} : vector<8x8xf32>, vector<8x8xf32>, vector<8x8xf32> -> vector<8x8xf32>
    %50 = arith.addf %49, %47 : vector<8x8xf32>
    %cst_21 = arith.constant 0.000000e+00 : f32
    %51 = vector.broadcast %cst_21 : f32 to vector<8x8xf32>
    %52 = arith.maximumf %50, %51 : vector<8x8xf32>
    %cst_22 = arith.constant 1.000000e+00 : f32
    %53 = vector.broadcast %cst_22 : f32 to vector<8x8xf32>
    %54 = arith.subf %53, %38 : vector<8x8xf32>
    %55 = arith.mulf %54, %26 : vector<8x8xf32>
    %56 = arith.mulf %38, %52 : vector<8x8xf32>
    %57 = arith.addf %55, %56 : vector<8x8xf32>
    %c0_23 = arith.constant 0 : index
    %c0_24 = arith.constant 0 : index
    %58 = vector.load %arg4[%c0_23, %c0_24] : memref<64x8xf32, #tpu.memory_space<vmem>>, vector<8x8xf32>
    tpu.vector_store %arg4[%c0_23, %c0_24], %57 {strides = array<i32>} : memref<64x8xf32, #tpu.memory_space<vmem>>, vector<8x8xf32>,
    %59 = vector.extract_strided_slice %19 {offsets = [8, 0], sizes = [8, 8], strides = [1, 1]} : vector<64x8xf32> to vector<8x8xf32>
    %60 = vector.extract_strided_slice %22 {offsets = [8, 0], sizes = [8, 16], strides = [1, 1]} : vector<64x16xf32> to vector<8x16xf32>
    %cst_25 = arith.constant dense<0.000000e+00> : vector<8x16xf32>
    %61 = tpu.matmul %57, %2, %cst_25 {dimension_numbers = #tpu.dot_dimension_numbers<[1], [0], [0], [1], [0, 0, 1, 1], [], []>} : vector<8x8xf32>, vector<8x16xf32>, vector<8x16xf32> -> vector<8x16xf32>
    %62 = arith.addf %61, %60 : vector<8x16xf32>
    %cst_26 = arith.constant 2.000000e+00 : f32
    %63 = vector.broadcast %cst_26 : f32 to vector<8x16xf32>
    %64 = arith.mulf %63, %62 : vector<8x16xf32>
    %65 = arith.negf %64 : vector<8x16xf32>
    %66 = math.exp %65 : vector<8x16xf32>
    %cst_27 = arith.constant 1.000000e+00 : f32
    %67 = vector.broadcast %cst_27 : f32 to vector<8x16xf32>
    %68 = arith.addf %67, %66 : vector<8x16xf32>
    %69 = arith.divf %67, %68 : vector<8x16xf32>
    %70 = vector.extract_strided_slice %69 {offsets = [0, 0], sizes = [8, 8], strides = [1, 1]} : vector<8x16xf32> to vector<8x8xf32>
    %71 = vector.extract_strided_slice %69 {offsets = [0, 8], sizes = [8, 8], strides = [1, 1]} : vector<8x16xf32> to vector<8x8xf32>
    %cst_28 = arith.constant 1.000000e+00 : f32
    %72 = vector.broadcast %cst_28 : f32 to vector<8x8xf32>
    %73 = arith.subf %72, %71 : vector<8x8xf32>
    %74 = arith.mulf %73, %24 : vector<8x8xf32>
    %75 = arith.mulf %71, %57 : vector<8x8xf32>
    %76 = arith.addf %74, %75 : vector<8x8xf32>
    %cst_29 = arith.constant dense<0.000000e+00> : vector<8x16xf32>
    %77 = tpu.matmul %76, %3, %cst_29 {dimension_numbers = #tpu.dot_dimension_numbers<[1], [0], [0], [1], [0, 0, 1, 1], [], []>} : vector<8x8xf32>, vector<8x16xf32>, vector<8x16xf32> -> vector<8x16xf32>
    %78 = vector.extract_strided_slice %77 {offsets = [0, 0], sizes = [8, 8], strides = [1, 1]} : vector<8x16xf32> to vector<8x8xf32>
    %79 = vector.extract_strided_slice %77 {offsets = [0, 8], sizes = [8, 8], strides = [1, 1]} : vector<8x16xf32> to vector<8x8xf32>
    %80 = arith.mulf %59, %78 : vector<8x8xf32>
    %cst_30 = arith.constant dense<0.000000e+00> : vector<8x8xf32>
    %81 = tpu.matmul %80, %4, %cst_30 {dimension_numbers = #tpu.dot_dimension_numbers<[1], [0], [0], [1], [0, 0, 1, 1], [], []>} : vector<8x8xf32>, vector<8x8xf32>, vector<8x8xf32> -> vector<8x8xf32>
    %82 = arith.addf %81, %79 : vector<8x8xf32>
    %cst_31 = arith.constant 0.000000e+00 : f32
    %83 = vector.broadcast %cst_31 : f32 to vector<8x8xf32>
    %84 = arith.maximumf %82, %83 : vector<8x8xf32>
    %cst_32 = arith.constant 1.000000e+00 : f32
    %85 = vector.broadcast %cst_32 : f32 to vector<8x8xf32>
    %86 = arith.subf %85, %70 : vector<8x8xf32>
    %87 = arith.mulf %86, %57 : vector<8x8xf32>
    %88 = arith.mulf %70, %84 : vector<8x8xf32>
    %89 = arith.addf %87, %88 : vector<8x8xf32>
    %c8 = arith.constant 8 : index
    %c0_33 = arith.constant 0 : index
    %90 = vector.load %arg4[%c8, %c0_33] : memref<64x8xf32, #tpu.memory_space<vmem>>, vector<8x8xf32>
    tpu.vector_store %arg4[%c8, %c0_33], %89 {strides = array<i32>} : memref<64x8xf32, #tpu.memory_space<vmem>>, vector<8x8xf32>,
    %91 = vector.extract_strided_slice %19 {offsets = [16, 0], sizes = [8, 8], strides = [1, 1]} : vector<64x8xf32> to vector<8x8xf32>
    %92 = vector.extract_strided_slice %22 {offsets = [16, 0], sizes = [8, 16], strides = [1, 1]} : vector<64x16xf32> to vector<8x16xf32>
    %cst_34 = arith.constant dense<0.000000e+00> : vector<8x16xf32>
    %93 = tpu.matmul %89, %2, %cst_34 {dimension_numbers = #tpu.dot_dimension_numbers<[1], [0], [0], [1], [0, 0, 1, 1], [], []>} : vector<8x8xf32>, vector<8x16xf32>, vector<8x16xf32> -> vector<8x16xf32>
    %94 = arith.addf %93, %92 : vector<8x16xf32>
    %cst_35 = arith.constant 2.000000e+00 : f32
    %95 = vector.broadcast %cst_35 : f32 to vector<8x16xf32>
    %96 = arith.mulf %95, %94 : vector<8x16xf32>
    %97 = arith.negf %96 : vector<8x16xf32>
    %98 = math.exp %97 : vector<8x16xf32>
    %cst_36 = arith.constant 1.000000e+00 : f32
    %99 = vector.broadcast %cst_36 : f32 to vector<8x16xf32>
    %100 = arith.addf %99, %98 : vector<8x16xf32>
    %101 = arith.divf %99, %100 : vector<8x16xf32>
    %102 = vector.extract_strided_slice %101 {offsets = [0, 0], sizes = [8, 8], strides = [1, 1]} : vector<8x16xf32> to vector<8x8xf32>
    %103 = vector.extract_strided_slice %101 {offsets = [0, 8], sizes = [8, 8], strides = [1, 1]} : vector<8x16xf32> to vector<8x8xf32>
    %cst_37 = arith.constant 1.000000e+00 : f32
    %104 = vector.broadcast %cst_37 : f32 to vector<8x8xf32>
    %105 = arith.subf %104, %103 : vector<8x8xf32>
    %106 = arith.mulf %105, %24 : vector<8x8xf32>
    %107 = arith.mulf %103, %89 : vector<8x8xf32>
    %108 = arith.addf %106, %107 : vector<8x8xf32>
    %cst_38 = arith.constant dense<0.000000e+00> : vector<8x16xf32>
    %109 = tpu.matmul %108, %3, %cst_38 {dimension_numbers = #tpu.dot_dimension_numbers<[1], [0], [0], [1], [0, 0, 1, 1], [], []>} : vector<8x8xf32>, vector<8x16xf32>, vector<8x16xf32> -> vector<8x16xf32>
    %110 = vector.extract_strided_slice %109 {offsets = [0, 0], sizes = [8, 8], strides = [1, 1]} : vector<8x16xf32> to vector<8x8xf32>
    %111 = vector.extract_strided_slice %109 {offsets = [0, 8], sizes = [8, 8], strides = [1, 1]} : vector<8x16xf32> to vector<8x8xf32>
    %112 = arith.mulf %91, %110 : vector<8x8xf32>
    %cst_39 = arith.constant dense<0.000000e+00> : vector<8x8xf32>
    %113 = tpu.matmul %112, %4, %cst_39 {dimension_numbers = #tpu.dot_dimension_numbers<[1], [0], [0], [1], [0, 0, 1, 1], [], []>} : vector<8x8xf32>, vector<8x8xf32>, vector<8x8xf32> -> vector<8x8xf32>
    %114 = arith.addf %113, %111 : vector<8x8xf32>
    %cst_40 = arith.constant 0.000000e+00 : f32
    %115 = vector.broadcast %cst_40 : f32 to vector<8x8xf32>
    %116 = arith.maximumf %114, %115 : vector<8x8xf32>
    %cst_41 = arith.constant 1.000000e+00 : f32
    %117 = vector.broadcast %cst_41 : f32 to vector<8x8xf32>
    %118 = arith.subf %117, %102 : vector<8x8xf32>
    %119 = arith.mulf %118, %89 : vector<8x8xf32>
    %120 = arith.mulf %102, %116 : vector<8x8xf32>
    %121 = arith.addf %119, %120 : vector<8x8xf32>
    %c16_42 = arith.constant 16 : index
    %c0_43 = arith.constant 0 : index
    %122 = vector.load %arg4[%c16_42, %c0_43] : memref<64x8xf32, #tpu.memory_space<vmem>>, vector<8x8xf32>
    tpu.vector_store %arg4[%c16_42, %c0_43], %121 {strides = array<i32>} : memref<64x8xf32, #tpu.memory_space<vmem>>, vector<8x8xf32>,
    %123 = vector.extract_strided_slice %19 {offsets = [24, 0], sizes = [8, 8], strides = [1, 1]} : vector<64x8xf32> to vector<8x8xf32>
    %124 = vector.extract_strided_slice %22 {offsets = [24, 0], sizes = [8, 16], strides = [1, 1]} : vector<64x16xf32> to vector<8x16xf32>
    %cst_44 = arith.constant dense<0.000000e+00> : vector<8x16xf32>
    %125 = tpu.matmul %121, %2, %cst_44 {dimension_numbers = #tpu.dot_dimension_numbers<[1], [0], [0], [1], [0, 0, 1, 1], [], []>} : vector<8x8xf32>, vector<8x16xf32>, vector<8x16xf32> -> vector<8x16xf32>
    %126 = arith.addf %125, %124 : vector<8x16xf32>
    %cst_45 = arith.constant 2.000000e+00 : f32
    %127 = vector.broadcast %cst_45 : f32 to vector<8x16xf32>
    %128 = arith.mulf %127, %126 : vector<8x16xf32>
    %129 = arith.negf %128 : vector<8x16xf32>
    %130 = math.exp %129 : vector<8x16xf32>
    %cst_46 = arith.constant 1.000000e+00 : f32
    %131 = vector.broadcast %cst_46 : f32 to vector<8x16xf32>
    %132 = arith.addf %131, %130 : vector<8x16xf32>
    %133 = arith.divf %131, %132 : vector<8x16xf32>
    %134 = vector.extract_strided_slice %133 {offsets = [0, 0], sizes = [8, 8], strides = [1, 1]} : vector<8x16xf32> to vector<8x8xf32>
    %135 = vector.extract_strided_slice %133 {offsets = [0, 8], sizes = [8, 8], strides = [1, 1]} : vector<8x16xf32> to vector<8x8xf32>
    %cst_47 = arith.constant 1.000000e+00 : f32
    %136 = vector.broadcast %cst_47 : f32 to vector<8x8xf32>
    %137 = arith.subf %136, %135 : vector<8x8xf32>
    %138 = arith.mulf %137, %24 : vector<8x8xf32>
    %139 = arith.mulf %135, %121 : vector<8x8xf32>
    %140 = arith.addf %138, %139 : vector<8x8xf32>
    %cst_48 = arith.constant dense<0.000000e+00> : vector<8x16xf32>
    %141 = tpu.matmul %140, %3, %cst_48 {dimension_numbers = #tpu.dot_dimension_numbers<[1], [0], [0], [1], [0, 0, 1, 1], [], []>} : vector<8x8xf32>, vector<8x16xf32>, vector<8x16xf32> -> vector<8x16xf32>
    %142 = vector.extract_strided_slice %141 {offsets = [0, 0], sizes = [8, 8], strides = [1, 1]} : vector<8x16xf32> to vector<8x8xf32>
    %143 = vector.extract_strided_slice %141 {offsets = [0, 8], sizes = [8, 8], strides = [1, 1]} : vector<8x16xf32> to vector<8x8xf32>
    %144 = arith.mulf %123, %142 : vector<8x8xf32>
    %cst_49 = arith.constant dense<0.000000e+00> : vector<8x8xf32>
    %145 = tpu.matmul %144, %4, %cst_49 {dimension_numbers = #tpu.dot_dimension_numbers<[1], [0], [0], [1], [0, 0, 1, 1], [], []>} : vector<8x8xf32>, vector<8x8xf32>, vector<8x8xf32> -> vector<8x8xf32>
    %146 = arith.addf %145, %143 : vector<8x8xf32>
    %cst_50 = arith.constant 0.000000e+00 : f32
    %147 = vector.broadcast %cst_50 : f32 to vector<8x8xf32>
    %148 = arith.maximumf %146, %147 : vector<8x8xf32>
    %cst_51 = arith.constant 1.000000e+00 : f32
    %149 = vector.broadcast %cst_51 : f32 to vector<8x8xf32>
    %150 = arith.subf %149, %134 : vector<8x8xf32>
    %151 = arith.mulf %150, %121 : vector<8x8xf32>
    %152 = arith.mulf %134, %148 : vector<8x8xf32>
    %153 = arith.addf %151, %152 : vector<8x8xf32>
    %c24_52 = arith.constant 24 : index
    %c0_53 = arith.constant 0 : index
    %154 = vector.load %arg4[%c24_52, %c0_53] : memref<64x8xf32, #tpu.memory_space<vmem>>, vector<8x8xf32>
    tpu.vector_store %arg4[%c24_52, %c0_53], %153 {strides = array<i32>} : memref<64x8xf32, #tpu.memory_space<vmem>>, vector<8x8xf32>,
    %155 = vector.extract_strided_slice %19 {offsets = [32, 0], sizes = [8, 8], strides = [1, 1]} : vector<64x8xf32> to vector<8x8xf32>
    %156 = vector.extract_strided_slice %22 {offsets = [32, 0], sizes = [8, 16], strides = [1, 1]} : vector<64x16xf32> to vector<8x16xf32>
    %cst_54 = arith.constant dense<0.000000e+00> : vector<8x16xf32>
    %157 = tpu.matmul %153, %2, %cst_54 {dimension_numbers = #tpu.dot_dimension_numbers<[1], [0], [0], [1], [0, 0, 1, 1], [], []>} : vector<8x8xf32>, vector<8x16xf32>, vector<8x16xf32> -> vector<8x16xf32>
    %158 = arith.addf %157, %156 : vector<8x16xf32>
    %cst_55 = arith.constant 2.000000e+00 : f32
    %159 = vector.broadcast %cst_55 : f32 to vector<8x16xf32>
    %160 = arith.mulf %159, %158 : vector<8x16xf32>
    %161 = arith.negf %160 : vector<8x16xf32>
    %162 = math.exp %161 : vector<8x16xf32>
    %cst_56 = arith.constant 1.000000e+00 : f32
    %163 = vector.broadcast %cst_56 : f32 to vector<8x16xf32>
    %164 = arith.addf %163, %162 : vector<8x16xf32>
    %165 = arith.divf %163, %164 : vector<8x16xf32>
    %166 = vector.extract_strided_slice %165 {offsets = [0, 0], sizes = [8, 8], strides = [1, 1]} : vector<8x16xf32> to vector<8x8xf32>
    %167 = vector.extract_strided_slice %165 {offsets = [0, 8], sizes = [8, 8], strides = [1, 1]} : vector<8x16xf32> to vector<8x8xf32>
    %cst_57 = arith.constant 1.000000e+00 : f32
    %168 = vector.broadcast %cst_57 : f32 to vector<8x8xf32>
    %169 = arith.subf %168, %167 : vector<8x8xf32>
    %170 = arith.mulf %169, %24 : vector<8x8xf32>
    %171 = arith.mulf %167, %153 : vector<8x8xf32>
    %172 = arith.addf %170, %171 : vector<8x8xf32>
    %cst_58 = arith.constant dense<0.000000e+00> : vector<8x16xf32>
    %173 = tpu.matmul %172, %3, %cst_58 {dimension_numbers = #tpu.dot_dimension_numbers<[1], [0], [0], [1], [0, 0, 1, 1], [], []>} : vector<8x8xf32>, vector<8x16xf32>, vector<8x16xf32> -> vector<8x16xf32>
    %174 = vector.extract_strided_slice %173 {offsets = [0, 0], sizes = [8, 8], strides = [1, 1]} : vector<8x16xf32> to vector<8x8xf32>
    %175 = vector.extract_strided_slice %173 {offsets = [0, 8], sizes = [8, 8], strides = [1, 1]} : vector<8x16xf32> to vector<8x8xf32>
    %176 = arith.mulf %155, %174 : vector<8x8xf32>
    %cst_59 = arith.constant dense<0.000000e+00> : vector<8x8xf32>
    %177 = tpu.matmul %176, %4, %cst_59 {dimension_numbers = #tpu.dot_dimension_numbers<[1], [0], [0], [1], [0, 0, 1, 1], [], []>} : vector<8x8xf32>, vector<8x8xf32>, vector<8x8xf32> -> vector<8x8xf32>
    %178 = arith.addf %177, %175 : vector<8x8xf32>
    %cst_60 = arith.constant 0.000000e+00 : f32
    %179 = vector.broadcast %cst_60 : f32 to vector<8x8xf32>
    %180 = arith.maximumf %178, %179 : vector<8x8xf32>
    %cst_61 = arith.constant 1.000000e+00 : f32
    %181 = vector.broadcast %cst_61 : f32 to vector<8x8xf32>
    %182 = arith.subf %181, %166 : vector<8x8xf32>
    %183 = arith.mulf %182, %153 : vector<8x8xf32>
    %184 = arith.mulf %166, %180 : vector<8x8xf32>
    %185 = arith.addf %183, %184 : vector<8x8xf32>
    %c32_62 = arith.constant 32 : index
    %c0_63 = arith.constant 0 : index
    %186 = vector.load %arg4[%c32_62, %c0_63] : memref<64x8xf32, #tpu.memory_space<vmem>>, vector<8x8xf32>
    tpu.vector_store %arg4[%c32_62, %c0_63], %185 {strides = array<i32>} : memref<64x8xf32, #tpu.memory_space<vmem>>, vector<8x8xf32>,
    %187 = vector.extract_strided_slice %19 {offsets = [40, 0], sizes = [8, 8], strides = [1, 1]} : vector<64x8xf32> to vector<8x8xf32>
    %188 = vector.extract_strided_slice %22 {offsets = [40, 0], sizes = [8, 16], strides = [1, 1]} : vector<64x16xf32> to vector<8x16xf32>
    %cst_64 = arith.constant dense<0.000000e+00> : vector<8x16xf32>
    %189 = tpu.matmul %185, %2, %cst_64 {dimension_numbers = #tpu.dot_dimension_numbers<[1], [0], [0], [1], [0, 0, 1, 1], [], []>} : vector<8x8xf32>, vector<8x16xf32>, vector<8x16xf32> -> vector<8x16xf32>
    %190 = arith.addf %189, %188 : vector<8x16xf32>
    %cst_65 = arith.constant 2.000000e+00 : f32
    %191 = vector.broadcast %cst_65 : f32 to vector<8x16xf32>
    %192 = arith.mulf %191, %190 : vector<8x16xf32>
    %193 = arith.negf %192 : vector<8x16xf32>
    %194 = math.exp %193 : vector<8x16xf32>
    %cst_66 = arith.constant 1.000000e+00 : f32
    %195 = vector.broadcast %cst_66 : f32 to vector<8x16xf32>
    %196 = arith.addf %195, %194 : vector<8x16xf32>
    %197 = arith.divf %195, %196 : vector<8x16xf32>
    %198 = vector.extract_strided_slice %197 {offsets = [0, 0], sizes = [8, 8], strides = [1, 1]} : vector<8x16xf32> to vector<8x8xf32>
    %199 = vector.extract_strided_slice %197 {offsets = [0, 8], sizes = [8, 8], strides = [1, 1]} : vector<8x16xf32> to vector<8x8xf32>
    %cst_67 = arith.constant 1.000000e+00 : f32
    %200 = vector.broadcast %cst_67 : f32 to vector<8x8xf32>
    %201 = arith.subf %200, %199 : vector<8x8xf32>
    %202 = arith.mulf %201, %24 : vector<8x8xf32>
    %203 = arith.mulf %199, %185 : vector<8x8xf32>
    %204 = arith.addf %202, %203 : vector<8x8xf32>
    %cst_68 = arith.constant dense<0.000000e+00> : vector<8x16xf32>
    %205 = tpu.matmul %204, %3, %cst_68 {dimension_numbers = #tpu.dot_dimension_numbers<[1], [0], [0], [1], [0, 0, 1, 1], [], []>} : vector<8x8xf32>, vector<8x16xf32>, vector<8x16xf32> -> vector<8x16xf32>
    %206 = vector.extract_strided_slice %205 {offsets = [0, 0], sizes = [8, 8], strides = [1, 1]} : vector<8x16xf32> to vector<8x8xf32>
    %207 = vector.extract_strided_slice %205 {offsets = [0, 8], sizes = [8, 8], strides = [1, 1]} : vector<8x16xf32> to vector<8x8xf32>
    %208 = arith.mulf %187, %206 : vector<8x8xf32>
    %cst_69 = arith.constant dense<0.000000e+00> : vector<8x8xf32>
    %209 = tpu.matmul %208, %4, %cst_69 {dimension_numbers = #tpu.dot_dimension_numbers<[1], [0], [0], [1], [0, 0, 1, 1], [], []>} : vector<8x8xf32>, vector<8x8xf32>, vector<8x8xf32> -> vector<8x8xf32>
    %210 = arith.addf %209, %207 : vector<8x8xf32>
    %cst_70 = arith.constant 0.000000e+00 : f32
    %211 = vector.broadcast %cst_70 : f32 to vector<8x8xf32>
    %212 = arith.maximumf %210, %211 : vector<8x8xf32>
    %cst_71 = arith.constant 1.000000e+00 : f32
    %213 = vector.broadcast %cst_71 : f32 to vector<8x8xf32>
    %214 = arith.subf %213, %198 : vector<8x8xf32>
    %215 = arith.mulf %214, %185 : vector<8x8xf32>
    %216 = arith.mulf %198, %212 : vector<8x8xf32>
    %217 = arith.addf %215, %216 : vector<8x8xf32>
    %c40_72 = arith.constant 40 : index
    %c0_73 = arith.constant 0 : index
    %218 = vector.load %arg4[%c40_72, %c0_73] : memref<64x8xf32, #tpu.memory_space<vmem>>, vector<8x8xf32>
    tpu.vector_store %arg4[%c40_72, %c0_73], %217 {strides = array<i32>} : memref<64x8xf32, #tpu.memory_space<vmem>>, vector<8x8xf32>,
    %219 = vector.extract_strided_slice %19 {offsets = [48, 0], sizes = [8, 8], strides = [1, 1]} : vector<64x8xf32> to vector<8x8xf32>
    %220 = vector.extract_strided_slice %22 {offsets = [48, 0], sizes = [8, 16], strides = [1, 1]} : vector<64x16xf32> to vector<8x16xf32>
    %cst_74 = arith.constant dense<0.000000e+00> : vector<8x16xf32>
    %221 = tpu.matmul %217, %2, %cst_74 {dimension_numbers = #tpu.dot_dimension_numbers<[1], [0], [0], [1], [0, 0, 1, 1], [], []>} : vector<8x8xf32>, vector<8x16xf32>, vector<8x16xf32> -> vector<8x16xf32>
    %222 = arith.addf %221, %220 : vector<8x16xf32>
    %cst_75 = arith.constant 2.000000e+00 : f32
    %223 = vector.broadcast %cst_75 : f32 to vector<8x16xf32>
    %224 = arith.mulf %223, %222 : vector<8x16xf32>
    %225 = arith.negf %224 : vector<8x16xf32>
    %226 = math.exp %225 : vector<8x16xf32>
    %cst_76 = arith.constant 1.000000e+00 : f32
    %227 = vector.broadcast %cst_76 : f32 to vector<8x16xf32>
    %228 = arith.addf %227, %226 : vector<8x16xf32>
    %229 = arith.divf %227, %228 : vector<8x16xf32>
    %230 = vector.extract_strided_slice %229 {offsets = [0, 0], sizes = [8, 8], strides = [1, 1]} : vector<8x16xf32> to vector<8x8xf32>
    %231 = vector.extract_strided_slice %229 {offsets = [0, 8], sizes = [8, 8], strides = [1, 1]} : vector<8x16xf32> to vector<8x8xf32>
    %cst_77 = arith.constant 1.000000e+00 : f32
    %232 = vector.broadcast %cst_77 : f32 to vector<8x8xf32>
    %233 = arith.subf %232, %231 : vector<8x8xf32>
    %234 = arith.mulf %233, %24 : vector<8x8xf32>
    %235 = arith.mulf %231, %217 : vector<8x8xf32>
    %236 = arith.addf %234, %235 : vector<8x8xf32>
    %cst_78 = arith.constant dense<0.000000e+00> : vector<8x16xf32>
    %237 = tpu.matmul %236, %3, %cst_78 {dimension_numbers = #tpu.dot_dimension_numbers<[1], [0], [0], [1], [0, 0, 1, 1], [], []>} : vector<8x8xf32>, vector<8x16xf32>, vector<8x16xf32> -> vector<8x16xf32>
    %238 = vector.extract_strided_slice %237 {offsets = [0, 0], sizes = [8, 8], strides = [1, 1]} : vector<8x16xf32> to vector<8x8xf32>
    %239 = vector.extract_strided_slice %237 {offsets = [0, 8], sizes = [8, 8], strides = [1, 1]} : vector<8x16xf32> to vector<8x8xf32>
    %240 = arith.mulf %219, %238 : vector<8x8xf32>
    %cst_79 = arith.constant dense<0.000000e+00> : vector<8x8xf32>
    %241 = tpu.matmul %240, %4, %cst_79 {dimension_numbers = #tpu.dot_dimension_numbers<[1], [0], [0], [1], [0, 0, 1, 1], [], []>} : vector<8x8xf32>, vector<8x8xf32>, vector<8x8xf32> -> vector<8x8xf32>
    %242 = arith.addf %241, %239 : vector<8x8xf32>
    %cst_80 = arith.constant 0.000000e+00 : f32
    %243 = vector.broadcast %cst_80 : f32 to vector<8x8xf32>
    %244 = arith.maximumf %242, %243 : vector<8x8xf32>
    %cst_81 = arith.constant 1.000000e+00 : f32
    %245 = vector.broadcast %cst_81 : f32 to vector<8x8xf32>
    %246 = arith.subf %245, %230 : vector<8x8xf32>
    %247 = arith.mulf %246, %217 : vector<8x8xf32>
    %248 = arith.mulf %230, %244 : vector<8x8xf32>
    %249 = arith.addf %247, %248 : vector<8x8xf32>
    %c48_82 = arith.constant 48 : index
    %c0_83 = arith.constant 0 : index
    %250 = vector.load %arg4[%c48_82, %c0_83] : memref<64x8xf32, #tpu.memory_space<vmem>>, vector<8x8xf32>
    tpu.vector_store %arg4[%c48_82, %c0_83], %249 {strides = array<i32>} : memref<64x8xf32, #tpu.memory_space<vmem>>, vector<8x8xf32>,
    %251 = vector.extract_strided_slice %19 {offsets = [56, 0], sizes = [8, 8], strides = [1, 1]} : vector<64x8xf32> to vector<8x8xf32>
    %252 = vector.extract_strided_slice %22 {offsets = [56, 0], sizes = [8, 16], strides = [1, 1]} : vector<64x16xf32> to vector<8x16xf32>
    %cst_84 = arith.constant dense<0.000000e+00> : vector<8x16xf32>
    %253 = tpu.matmul %249, %2, %cst_84 {dimension_numbers = #tpu.dot_dimension_numbers<[1], [0], [0], [1], [0, 0, 1, 1], [], []>} : vector<8x8xf32>, vector<8x16xf32>, vector<8x16xf32> -> vector<8x16xf32>
    %254 = arith.addf %253, %252 : vector<8x16xf32>
    %cst_85 = arith.constant 2.000000e+00 : f32
    %255 = vector.broadcast %cst_85 : f32 to vector<8x16xf32>
    %256 = arith.mulf %255, %254 : vector<8x16xf32>
    %257 = arith.negf %256 : vector<8x16xf32>
    %258 = math.exp %257 : vector<8x16xf32>
    %cst_86 = arith.constant 1.000000e+00 : f32
    %259 = vector.broadcast %cst_86 : f32 to vector<8x16xf32>
    %260 = arith.addf %259, %258 : vector<8x16xf32>
    %261 = arith.divf %259, %260 : vector<8x16xf32>
    %262 = vector.extract_strided_slice %261 {offsets = [0, 0], sizes = [8, 8], strides = [1, 1]} : vector<8x16xf32> to vector<8x8xf32>
    %263 = vector.extract_strided_slice %261 {offsets = [0, 8], sizes = [8, 8], strides = [1, 1]} : vector<8x16xf32> to vector<8x8xf32>
    %cst_87 = arith.constant 1.000000e+00 : f32
    %264 = vector.broadcast %cst_87 : f32 to vector<8x8xf32>
    %265 = arith.subf %264, %263 : vector<8x8xf32>
    %266 = arith.mulf %265, %24 : vector<8x8xf32>
    %267 = arith.mulf %263, %249 : vector<8x8xf32>
    %268 = arith.addf %266, %267 : vector<8x8xf32>
    %cst_88 = arith.constant dense<0.000000e+00> : vector<8x16xf32>
    %269 = tpu.matmul %268, %3, %cst_88 {dimension_numbers = #tpu.dot_dimension_numbers<[1], [0], [0], [1], [0, 0, 1, 1], [], []>} : vector<8x8xf32>, vector<8x16xf32>, vector<8x16xf32> -> vector<8x16xf32>
    %270 = vector.extract_strided_slice %269 {offsets = [0, 0], sizes = [8, 8], strides = [1, 1]} : vector<8x16xf32> to vector<8x8xf32>
    %271 = vector.extract_strided_slice %269 {offsets = [0, 8], sizes = [8, 8], strides = [1, 1]} : vector<8x16xf32> to vector<8x8xf32>
    %272 = arith.mulf %251, %270 : vector<8x8xf32>
    %cst_89 = arith.constant dense<0.000000e+00> : vector<8x8xf32>
    %273 = tpu.matmul %272, %4, %cst_89 {dimension_numbers = #tpu.dot_dimension_numbers<[1], [0], [0], [1], [0, 0, 1, 1], [], []>} : vector<8x8xf32>, vector<8x8xf32>, vector<8x8xf32> -> vector<8x8xf32>
    %274 = arith.addf %273, %271 : vector<8x8xf32>
    %cst_90 = arith.constant 0.000000e+00 : f32
    %275 = vector.broadcast %cst_90 : f32 to vector<8x8xf32>
    %276 = arith.maximumf %274, %275 : vector<8x8xf32>
    %cst_91 = arith.constant 1.000000e+00 : f32
    %277 = vector.broadcast %cst_91 : f32 to vector<8x8xf32>
    %278 = arith.subf %277, %262 : vector<8x8xf32>
    %279 = arith.mulf %278, %249 : vector<8x8xf32>
    %280 = arith.mulf %262, %276 : vector<8x8xf32>
    %281 = arith.addf %279, %280 : vector<8x8xf32>
    %c56 = arith.constant 56 : index
    %c0_92 = arith.constant 0 : index
    %282 = vector.load %arg4[%c56, %c0_92] : memref<64x8xf32, #tpu.memory_space<vmem>>, vector<8x8xf32>
    tpu.vector_store %arg4[%c56, %c0_92], %281 {strides = array<i32>} : memref<64x8xf32, #tpu.memory_space<vmem>>, vector<8x8xf32>,
    return
  }
  func.func @transform_0(%arg0: i32) -> (i32, i32) {
    %c0_i32 = arith.constant 0 : i32
    %c0_i32_0 = arith.constant 0 : i32
    %c0_i32_1 = arith.constant 0 : i32
    return %c0_i32, %c0_i32_0 : i32, i32
  }
  func.func @transform_1(%arg0: i32) -> (i32, i32) {
    %c0_i32 = arith.constant 0 : i32
    %c0_i32_0 = arith.constant 0 : i32
    %c0_i32_1 = arith.constant 0 : i32
    return %c0_i32, %c0_i32_0 : i32, i32
  }
  func.func @transform_2(%arg0: i32) -> (i32, i32) {
    %c0_i32 = arith.constant 0 : i32
    %c0_i32_0 = arith.constant 0 : i32
    %c0_i32_1 = arith.constant 0 : i32
    return %c0_i32, %c0_i32_0 : i32, i32
  }
  func.func @transform_3(%arg0: i32) -> (i32, i32) {
    %c0_i32 = arith.constant 0 : i32
    %c0_i32_0 = arith.constant 0 : i32
    %c0_i32_1 = arith.constant 0 : i32
    return %c0_i32, %c0_i32_0 : i32, i32
  }
}

</mosaic_0001>

<bundles_post_ra>
// kernel: farnn_forward.1
= control target key start
LH: loop header
LB: loop body
LE: loop exit
PB: predicated region body
PF: predicated region fallthrough
CT: control target
= control target key end

     0   :  { %vm40_vm0 = vcmask 130048   ;;  %v2641_v11 = vmov 0.0   ;;  %vm2642_vm1 = vmmov 0   ;;  %v178_v15 = vlaneseq  ;;  %s2644_s9 = smov 120   ;;  %s3010_s2 = inlined_call_operand.vmem [shape: f32[56,16], index: 2, kind: input, shape index: {}]   ;;  %s3011_s0 = inlined_call_operand.vmem [shape: f32[64,16], index: 0, kind: input, shape index: {}]   ;;  %s3012_s1 = inlined_call_operand.vmem [shape: f32[64,8], index: 1, kind: input, shape index: {}]   ;;  %s3013_s3 = inlined_call_operand.vmem [shape: f32[64,8], index: 3, kind: output, shape index: {}]  }
   0x1   :  { %v15_v0 = vld [vmem:[%s3010_s2 + $0x8] sm:$0xff]  ;;  %v14_v1 = vld [vmem:[%s3010_s2] sm:$0xff]  ;;  %v26_v4 = vld [vmem:[%s3011_s0 + $0x10] sm:$0xff]  ;;  %vm215_vm2 = vcmask 64512  }
   0x2   :  { %v24_v2 = vld [vmem:[%s3011_s0] sm:$0xff]  ;;  %2439 = vmatprep.subr.mxu0 %v15_v0  ;;  %v25_v3 = vld [vmem:[%s3011_s0 + $0x8] sm:$0xff]  ;;  %v27_v5 = vld [vmem:[%s3011_s0 + $0x18] sm:$0xff]  ;;  %v179_v18 = vshrl.u32 %v178_v15, 7 }
   0x3   :  { %2443 = vmatprep.mubr.msk.f32.mxu0 %vm40_vm0, %v24_v2  ;;  %2440 = vmatpush3.msra.mxu0 %v15_v0  ;;  %v28_v6 = vld [vmem:[%s3011_s0 + $0x20] sm:$0xff]  ;;  %v29_v7 = vld [vmem:[%s3011_s0 + $0x28] sm:$0xff]  ;;  %v30_v8 = vld [vmem:[%s3011_s0 + $0x30] sm:$0xff] }
   0x4   :  { %2441 = vmatprep.subr.mxu0 %v14_v1  ;;  %v31_v9 = vld [vmem:[%s3011_s0 + $0x38] sm:$0xff]  ;;  %v16_v10 = vld [vmem:[%s3010_s2 + $0x10] sm:$0xff]  ;;  %s2643_s0 = smov 8   ;;  %v180_v22 = vsub.s32 0, %v179_v18  ;;  %v32_v26 = vld [vmem:[%s3012_s1] sm:$0xff] }
   0x5   :  { %2442 = vmatpush3.msra.mxu0 %v14_v1  ;;  %2455 = vmatprep.subr.mxu1 %v16_v10  ;;  %v2338_v12 = vld [vmem:[%s3010_s2 + $0x33] ss:$0 sm:$0xff]  ;;  %v2717_v13 = vld [vmem:[%s3010_s2 + $0x32] ss:$0 sm:$0xff]  ;;  %v20_v19 = vld [vmem:[%s3010_s2 + $0x30] sm:$0x1] }
   0x6   :  { %2444 = vmatmul.mubr.msk.f32.vlgmr.msra.gmra.mxu0 %vm40_vm0, %v25_v3  ;;  %2456 = vmatpush3.msra.mxu1 %v16_v10  ;;  %v190_v23 = vsub.f32 1.0, %v20_v19  ;;  %v181_v27 = vrot.slane %v20_v19, %v180_v22  ;;  %v33_v29 = vld [vmem:[%s3012_s1 + $0x8] sm:$0xff]  ;;  %v34_v36 = vld [vmem:[%s3012_s1 + $0x10] sm:$0xff]  ;;  %v35_v38 = vld [vmem:[%s3012_s1 + $0x18] sm:$0xff] }
   0x7   :  { %2446 = vmatprep.mubr.msk.f32.mxu0 %vm40_vm0, %v26_v4  ;;  %2469 = vmatprep.subr.mxu1 %v2641_v11  ;;  %v2743_v44 = vld [vmem:[%s3010_s2 + $0x18] sm:$0xff]  ;;  %v36_v47 = vld [vmem:[%s3012_s1 + $0x20] sm:$0xff]  ;;  %v37_v49 = vld [vmem:[%s3012_s1 + $0x28] sm:$0xff] }
   0x8   :  { %2474 = vmatprep.subr.mxu0 %v2641_v11  ;;  %435 = vrot.lane.b32.xlu0 %v2338_v12, %s2643_s0  ;;  %v194_v28 = vrot.slane %v190_v23, %v180_v22  ;;  %v182_v32 = vmul.f32 %v181_v27, %v32_v26  ;;  %v183_v34 = vmul.f32 %v181_v27, %v33_v29  ;;  %v38_v57 = vld [vmem:[%s3012_s1 + $0x30] sm:$0xff]  ;;  %v39_v59 = vld [vmem:[%s3012_s1 + $0x38] sm:$0xff] }
   0x9   :  { %v184_v41 = vmul.f32 %v181_v27, %v34_v36  ;;  %v185_v45 = vmul.f32 %v181_v27, %v35_v38  ;;  %v186_v52 = vmul.f32 %v181_v27, %v36_v47  ;;  %v187_v55 = vmul.f32 %v181_v27, %v37_v49 }
   0xa   :  { %2447 = vmatmul.mubr.msk.f32.gmra.mxu0 %vm40_vm0, %v27_v5  ;;  %v188_v62 = vmul.f32 %v181_v27, %v38_v57  ;;  %v189_v1 = vmul.f32 %v181_v27, %v39_v59 }
   0xb   :  { %2449 = vmatprep.mubr.msk.f32.mxu0 %vm40_vm0, %v28_v6  ;;  %v2796_v6 = vld [vmem:[%s3010_s2 + $0x20] sm:$0xff] }
   0xc   :  { %439 = vrot.lane.b32.xlu0 %v2717_v13, %s2643_s0  ;;  %2475 = vmatpush3.msra.mxu0 %v2796_v6 }
   0xd   :  { %2484 = vmatprep.subr.mxu0 %v2641_v11 }
   0xe   :  { %2450 = vmatmul.mubr.msk.f32.gmra.mxu0 %vm40_vm0, %v29_v7  ;;  %v2329_v7 = vld [vmem:[%s3010_s2 + $0x31] ss:$0 sm:$0xff] }
   0xf   :  { %2452 = vmatprep.mubr.msk.f32.mxu0 %vm40_vm0, %v30_v8 }
  0x12   :  { %2453 = vmatmul.mubr.msk.f32.gmra.mxu0 %vm40_vm0, %v31_v9 }
  0x13   :  { %2476 = vmatprep.mubr.msk.f32.mxu0 %vm2642_vm1, %v2641_v11 }
  0xc6   :  { %v2445_v14 = vpop.f32.mrf.mxu0 }
  0xc7   :  { %2593 = vtanh.f32 %v2445_v14 }
  0xc8   :  { %v131_v16 = vpop.f32.mrf.mxu0 }
  0xc9   :  { %2595 = vtanh.f32 %v131_v16 }
  0xca   :  { %v2448_v17 = vpop.f32.mrf.mxu0 }
  0xcb   :  { %2597 = vtanh.f32 %v2448_v17 }
  0xcc   :  { %v141_v20 = vpop.f32.mrf.mxu0 }
  0xcd   :  { %2599 = vtanh.f32 %v141_v20 }
  0xce   :  { %v2451_v21 = vpop.f32.mrf.mxu0 }
  0xcf   :  { %2601 = vtanh.f32 %v2451_v21 }
  0xd0   :  { %v151_v24 = vpop.f32.mrf.mxu0 }
  0xd1   :  { %2603 = vtanh.f32 %v151_v24 }
  0xd2   :  { %v2454_v25 = vpop.f32.mrf.mxu0 }
  0xd3   :  { %2605 = vtanh.f32 %v2454_v25 }
  0xd4   :  { %v2594_v30 = vpop.eup %2593  ;;  %v161_v31 = vpop.f32.mrf.mxu0 }
  0xd5   :  { %2607 = vtanh.f32 %v161_v31  ;;  %v196_v35 = vmul.f32 %v2594_v30, %v194_v28 }
  0xd6   :  { %v2596_v33 = vpop.eup %2595 }
  0xd7   :  { %v195_v37 = vmul.f32 %v2596_v33, %v194_v28  ;;  %v2738_v43 = vadd.f32 %v196_v35, %v183_v34  ;;  %v2817_v33 = vpop.permute.xlu0 %435  ;;  %v2822_v34 = vld [vmem:[%s3010_s2 + $0x28] sm:$0xff] }
  0xd8   :  { %v2598_v39 = vpop.eup %2597 }
  0xd9   :  { %v2736_v40 = vadd.f32 %v195_v37, %v182_v32  ;;  %v198_v46 = vmul.f32 %v2598_v39, %v194_v28 }
  0xda   :  { %v2600_v42 = vpop.eup %2599 }
  0xdb   :  { %2457 = vmatprep.mubr.msk.f32.mxu1 %vm215_vm2, %v2736_v40  ;;  %v197_v48 = vmul.f32 %v2600_v42, %v194_v28  ;;  %v2758_v54 = vadd.f32 %v198_v46, %v185_v45  ;;  %v440_v36 = vpop.permute.xlu0 %439 }
  0xdc   :  { %v2602_v50 = vpop.eup %2601  ;;  %2458 = vmatmul.mubr.msk.f32.vlgmr.msra.gmra.mxu1 %vm215_vm2, %v2738_v43 }
  0xdd   :  { %2470 = vmatpush3.msra.mxu1 %v2743_v44  ;;  %v2756_v51 = vadd.f32 %v197_v48, %v184_v41  ;;  %v200_v56 = vmul.f32 %v2602_v50, %v194_v28 }
  0xde   :  { %v2604_v53 = vpop.eup %2603  ;;  %2479 = vmatprep.subr.mxu1 %v2641_v11 }
  0xdf   :  { %2460 = vmatprep.mubr.msk.f32.mxu1 %vm215_vm2, %v2756_v51  ;;  %v199_v58 = vmul.f32 %v2604_v53, %v194_v28  ;;  %v2773_v0 = vadd.f32 %v200_v56, %v187_v55 }
  0xe0   :  { %v2606_v60 = vpop.eup %2605  ;;  %2461 = vmatmul.mubr.msk.f32.gmra.mxu1 %vm215_vm2, %v2758_v54 }
  0xe1   :  { %v2771_v61 = vadd.f32 %v199_v58, %v186_v52  ;;  %v202_v2 = vmul.f32 %v2606_v60, %v194_v28 }
  0xe2   :  { %v2608_v63 = vpop.eup %2607 }
  0xe3   :  { %2463 = vmatprep.mubr.msk.f32.mxu1 %vm215_vm2, %v2771_v61  ;;  %v201_v3 = vmul.f32 %v2608_v63, %v194_v28  ;;  %v2781_v5 = vadd.f32 %v202_v2, %v189_v1 }
  0xe4   :  { %2464 = vmatmul.mubr.msk.f32.gmra.mxu1 %vm215_vm2, %v2773_v0 }
  0xe5   :  { %v2779_v4 = vadd.f32 %v201_v3, %v188_v62 }
  0xe7   :  { %2466 = vmatprep.mubr.msk.f32.mxu1 %vm215_vm2, %v2779_v4 }
  0xe8   :  { %2467 = vmatmul.mubr.msk.f32.gmra.mxu1 %vm215_vm2, %v2781_v5 }
  0xe9   :  { %2471 = vmatprep.mubr.msk.f32.mxu1 %vm2642_vm1, %v2641_v11 }
  0xec   :  { %2472 = vmatmul.mubr.msk.f32.vlgmr.msra.gmra.mxu1 %vm215_vm2, %v2717_v13 }
  0xed   :  { %2481 = vmatprep.mubr.msk.f32.mxu1 %vm2642_vm1, %v2641_v11  ;;  %2480 = vmatpush3.msra.mxu1 %v2822_v34 }
  0xee   :  { %2489 = vmatprep.subr.mxu1 %v2641_v11 }
 0x19c   :  { %v2459_v8 = vpop.f32.mrf.mxu1 }
 0x19d   :  { %v2803_v9 = vadd.f32 %v2459_v8, %v2329_v7 }
 0x19e   :  { %v306_v10 = vpop.f32.mrf.mxu1 }
 0x19f   :  { %v307_v24 = vadd.f32 %v2329_v7, %v306_v10 }
 0x1a0   :  { %v2462_v12 = vpop.f32.mrf.mxu1 }
 0x1a1   :  { %v2805_v14 = vadd.f32 %v2462_v12, %v2329_v7 }
 0x1a2   :  { %v316_v15 = vpop.f32.mrf.mxu1 }
 0x1a3   :  { %v2807_v16 = vadd.f32 %v2329_v7, %v316_v15 }
 0x1a4   :  { %v2465_v17 = vpop.f32.mrf.mxu1 }
 0x1a5   :  { %v2809_v18 = vadd.f32 %v2465_v17, %v2329_v7 }
 0x1a6   :  { %v326_v19 = vpop.f32.mrf.mxu1 }
 0x1a7   :  { %v2811_v20 = vadd.f32 %v2329_v7, %v326_v19 }
 0x1a8   :  { %v2468_v21 = vpop.f32.mrf.mxu1 }
 0x1a9   :  { %v2813_v22 = vadd.f32 %v2468_v21, %v2329_v7 }
 0x1aa   :  { %v336_v23 = vpop.f32.mrf.mxu1 }
 0x1ab   :  { %v2815_v25 = vadd.f32 %v2329_v7, %v336_v23 }
 0x1ac   :  { %v422_v26 = vpop.f32.mrf.mxu1 }
 0x1ad   :  { %v423_v27 = vadd.f32 %v422_v26, %v307_v24 }
 0x1ae   :  { %v2473_v28 = vpop.f32.mrf.mxu1 }
 0x1af   :  { %v2341_v29 = vmul.f32 -2.0, %v423_v27 }
 0x1b1   :  { %v428_v30 = vmul.f32 1.442695, %v2341_v29 }
 0x1b3   :  { %2609 = vpow2.f32 %v428_v30 }
 0x1c0   :  { %v2610_v31 = vpop.eup %2609 }
 0x1c1   :  { %v430_v32 = vadd.f32 1.0, %v2610_v31 }
 0x1c3   :  { %2611 = vrcp.f32 %v430_v32 }
 0x1d0   :  { %v2612_v35 = vpop.eup %2611 }
 0x1d1   :  { %v433_v37 = vsub.f32 1.0, %v2612_v35  ;;  %v442_v38 = vmul.f32 %v2612_v35, %v440_v36 }
 0x1d3   :  { %v438_v39 = vmul.f32 %v2817_v33, %v433_v37  ;;  %v598_v55 = vmul.f32 %v2717_v13, %v433_v37 }
 0x1d5   :  { %v443_v41 = vadd.f32 %v442_v38, %v438_v39 }
 0x1d7   :  { %445 = vrot.lane.b32.xlu1 %v443_v41, %s2644_s9 }
 0x249   :  { %v446_v42 = vpop.permute.xlu1 %445 }
 0x24a   :  { %2477 = vmatmul.mubr.msk.f32.vlgmr.msra.gmra.mxu0 %vm215_vm2, %v446_v42 }
 0x24b   :  { %2485 = vmatpush3.msra.mxu0 %v2743_v44  ;;  %2486 = vmatprep.mubr.msk.f32.mxu0 %vm2642_vm1, %v2641_v11 }
 0x24c   :  { %2494 = vmatprep.subr.mxu0 %v2641_v11 }
 0x30a   :  { %v515_v45 = vpop.f32.mrf.mxu0 }
 0x30b   :  { %v519_v46 = vmul.f32 %v515_v45, %v2736_v40  ;;  %521 = vrot.lane.b32.xlu1 %v515_v45, %s2644_s9 }
 0x30c   :  { %v2478_v47 = vpop.f32.mrf.mxu0 }
 0x30d   :  { %2482 = vmatmul.mubr.msk.f32.vlgmr.msra.gmra.mxu1 %vm215_vm2, %v519_v46 }
 0x30e   :  { %2490 = vmatpush3.msra.mxu1 %v2796_v6  ;;  %2491 = vmatprep.mubr.msk.f32.mxu1 %vm2642_vm1, %v2641_v11 }
 0x30f   :  { %2499 = vmatprep.subr.mxu1 %v2641_v11 }
 0x37d   :  { %v522_v48 = vpop.permute.xlu1 %521 }
 0x3cd   :  { %v593_v49 = vpop.f32.mrf.mxu1 }
 0x3ce   :  { %v594_v50 = vadd.f32 %v593_v49, %v522_v48 }
 0x3cf   :  { %v2483_v52 = vpop.f32.mrf.mxu1 }
 0x3d0   :  { %v597_v53 = vmax.f32 %v594_v50, 0.0 }
 0x3d2   :  { %v599_v40 = vmul.f32 %v2612_v35, %v597_v53 }
 0x3d4   :  { %v600_v56 = vadd.f32 %v599_v40, %v598_v55 }
 0x3d6   :  { %601 = vst.msk [vmem:[%s3013_s3] sm:$0xff] %vm215_vm2, %v600_v56  ;;  %684 = vrot.lane.b32.xlu0 %v600_v56, %s2643_s0  ;;  %2487 = vmatmul.mubr.msk.f32.vlgmr.msra.gmra.mxu0 %vm215_vm2, %v600_v56 }
 0x3d7   :  { %2495 = vmatpush3.msra.mxu0 %v2822_v34  ;;  %2496 = vmatprep.mubr.msk.f32.mxu0 %vm2642_vm1, %v2641_v11 }
 0x3d8   :  { %2504 = vmatprep.subr.mxu0 %v2641_v11 }
 0x448   :  { %v685_v3 = vpop.permute.xlu0 %684 }
 0x496   :  { %v671_v57 = vpop.f32.mrf.mxu0 }
 0x497   :  { %v672_v13 = vadd.f32 %v671_v57, %v2803_v9 }
 0x498   :  { %v2488_v58 = vpop.f32.mrf.mxu0 }
 0x499   :  { %v2345_v59 = vmul.f32 -2.0, %v672_v13 }
 0x49b   :  { %v677_v60 = vmul.f32 1.442695, %v2345_v59 }
 0x49d   :  { %2613 = vpow2.f32 %v677_v60 }
 0x4aa   :  { %v2614_v62 = vpop.eup %2613 }
 0x4ab   :  { %v679_v63 = vadd.f32 1.0, %v2614_v62 }
 0x4ad   :  { %2615 = vrcp.f32 %v679_v63 }
 0x4ba   :  { %v2616_v1 = vpop.eup %2615 }
 0x4bb   :  { %v682_v2 = vsub.f32 1.0, %v2616_v1  ;;  %v687_v8 = vmul.f32 %v2616_v1, %v685_v3 }
 0x4bd   :  { %v683_v7 = vmul.f32 %v682_v2, %v2817_v33  ;;  %v843_v27 = vmul.f32 %v682_v2, %v600_v56 }
 0x4bf   :  { %v688_v10 = vadd.f32 %v687_v8, %v683_v7 }
 0x4c1   :  { %690 = vrot.lane.b32.xlu1 %v688_v10, %s2644_s9 }
 0x533   :  { %v691_v12 = vpop.permute.xlu1 %690 }
 0x534   :  { %2492 = vmatmul.mubr.msk.f32.vlgmr.msra.gmra.mxu1 %vm215_vm2, %v691_v12 }
 0x535   :  { %2500 = vmatpush3.msra.mxu1 %v2743_v44  ;;  %2501 = vmatprep.mubr.msk.f32.mxu1 %vm2642_vm1, %v2641_v11 }
 0x536   :  { %2509 = vmatprep.subr.mxu1 %v2641_v11 }
 0x5f4   :  { %v760_v9 = vpop.f32.mrf.mxu1 }
 0x5f5   :  { %v764_v15 = vmul.f32 %v760_v9, %v2738_v43  ;;  %766 = vrot.lane.b32.xlu0 %v760_v9, %s2644_s9 }
 0x5f6   :  { %v2493_v17 = vpop.f32.mrf.mxu1 }
 0x5f7   :  { %2497 = vmatmul.mubr.msk.f32.vlgmr.msra.gmra.mxu0 %vm215_vm2, %v764_v15 }
 0x5f8   :  { %2505 = vmatpush3.msra.mxu0 %v2796_v6  ;;  %2506 = vmatprep.mubr.msk.f32.mxu0 %vm2642_vm1, %v2641_v11 }
 0x5f9   :  { %2514 = vmatprep.subr.mxu0 %v2641_v11 }
 0x667   :  { %v767_v19 = vpop.permute.xlu0 %766 }
 0x6b7   :  { %v838_v21 = vpop.f32.mrf.mxu0 }
 0x6b8   :  { %v839_v23 = vadd.f32 %v838_v21, %v767_v19 }
 0x6b9   :  { %v2498_v24 = vpop.f32.mrf.mxu0 }
 0x6ba   :  { %v842_v26 = vmax.f32 %v839_v23, 0.0 }
 0x6bc   :  { %v844_v28 = vmul.f32 %v2616_v1, %v842_v26 }
 0x6be   :  { %v845_v43 = vadd.f32 %v844_v28, %v843_v27 }
 0x6c0   :  { %846 = vst.msk [vmem:[%s3013_s3 + $0x8] sm:$0xff] %vm215_vm2, %v845_v43  ;;  %929 = vrot.lane.b32.xlu1 %v845_v43, %s2643_s0  ;;  %2502 = vmatmul.mubr.msk.f32.vlgmr.msra.gmra.mxu1 %vm215_vm2, %v845_v43 }
 0x6c1   :  { %2510 = vmatpush3.msra.mxu1 %v2822_v34  ;;  %2511 = vmatprep.mubr.msk.f32.mxu1 %vm2642_vm1, %v2641_v11 }
 0x6c2   :  { %2519 = vmatprep.subr.mxu1 %v2641_v11 }
 0x732   :  { %v930_v41 = vpop.permute.xlu1 %929 }
 0x780   :  { %v916_v29 = vpop.f32.mrf.mxu1 }
 0x781   :  { %v917_v30 = vadd.f32 %v916_v29, %v2807_v16 }
 0x782   :  { %v2503_v31 = vpop.f32.mrf.mxu1 }
 0x783   :  { %v2349_v32 = vmul.f32 -2.0, %v917_v30 }
 0x785   :  { %v922_v35 = vmul.f32 1.442695, %v2349_v32 }
 0x787   :  { %2617 = vpow2.f32 %v922_v35 }
 0x794   :  { %v2618_v36 = vpop.eup %2617 }
 0x795   :  { %v924_v37 = vadd.f32 1.0, %v2618_v36 }
 0x797   :  { %2619 = vrcp.f32 %v924_v37 }
 0x7a4   :  { %v2620_v38 = vpop.eup %2619 }
 0x7a5   :  { %v927_v39 = vsub.f32 1.0, %v2620_v38  ;;  %v932_v45 = vmul.f32 %v2620_v38, %v930_v41 }
 0x7a7   :  { %v928_v42 = vmul.f32 %v927_v39, %v2817_v33  ;;  %v1088_v56 = vmul.f32 %v927_v39, %v845_v43 }
 0x7a9   :  { %v933_v46 = vadd.f32 %v932_v45, %v928_v42 }
 0x7ab   :  { %935 = vrot.lane.b32.xlu0 %v933_v46, %s2644_s9 }
 0x81d   :  { %v936_v47 = vpop.permute.xlu0 %935 }
 0x81e   :  { %2507 = vmatmul.mubr.msk.f32.vlgmr.msra.gmra.mxu0 %vm215_vm2, %v936_v47 }
 0x81f   :  { %2515 = vmatpush3.msra.mxu0 %v2743_v44  ;;  %2516 = vmatprep.mubr.msk.f32.mxu0 %vm2642_vm1, %v2641_v11 }
 0x820   :  { %2524 = vmatprep.subr.mxu0 %v2641_v11 }
 0x8de   :  { %v1005_v16 = vpop.f32.mrf.mxu0 }
 0x8df   :  { %v1009_v48 = vmul.f32 %v1005_v16, %v2756_v51  ;;  %1011 = vrot.lane.b32.xlu1 %v1005_v16, %s2644_s9 }
 0x8e0   :  { %v2508_v49 = vpop.f32.mrf.mxu0 }
 0x8e1   :  { %2512 = vmatmul.mubr.msk.f32.vlgmr.msra.gmra.mxu1 %vm215_vm2, %v1009_v48 }
 0x8e2   :  { %2520 = vmatpush3.msra.mxu1 %v2796_v6  ;;  %2521 = vmatprep.mubr.msk.f32.mxu1 %vm2642_vm1, %v2641_v11 }
 0x8e3   :  { %2529 = vmatprep.subr.mxu1 %v2641_v11 }
 0x951   :  { %v1012_v50 = vpop.permute.xlu1 %1011 }
 0x9a1   :  { %v1083_v52 = vpop.f32.mrf.mxu1 }
 0x9a2   :  { %v1084_v53 = vadd.f32 %v1083_v52, %v1012_v50 }
 0x9a3   :  { %v2513_v55 = vpop.f32.mrf.mxu1 }
 0x9a4   :  { %v1087_v40 = vmax.f32 %v1084_v53, 0.0 }
 0x9a6   :  { %v1089_v57 = vmul.f32 %v2620_v38, %v1087_v40 }
 0x9a8   :  { %v1090_v51 = vadd.f32 %v1089_v57, %v1088_v56 }
 0x9aa   :  { %1091 = vst.msk [vmem:[%s3013_s3 + $0x10] sm:$0xff] %vm215_vm2, %v1090_v51  ;;  %1174 = vrot.lane.b32.xlu0 %v1090_v51, %s2643_s0  ;;  %2517 = vmatmul.mubr.msk.f32.vlgmr.msra.gmra.mxu0 %vm215_vm2, %v1090_v51 }
 0x9ab   :  { %2525 = vmatpush3.msra.mxu0 %v2822_v34  ;;  %2526 = vmatprep.mubr.msk.f32.mxu0 %vm2642_vm1, %v2641_v11 }
 0x9ac   :  { %2534 = vmatprep.subr.mxu0 %v2641_v11 }
 0xa1c   :  { %v1175_v7 = vpop.permute.xlu0 %1174 }
 0xa6a   :  { %v1161_v13 = vpop.f32.mrf.mxu0 }
 0xa6b   :  { %v1162_v58 = vadd.f32 %v1161_v13, %v2805_v14 }
 0xa6c   :  { %v2518_v59 = vpop.f32.mrf.mxu0 }
 0xa6d   :  { %v2353_v60 = vmul.f32 -2.0, %v1162_v58 }
 0xa6f   :  { %v1167_v62 = vmul.f32 1.442695, %v2353_v60 }
 0xa71   :  { %2621 = vpow2.f32 %v1167_v62 }
 0xa7e   :  { %v2622_v63 = vpop.eup %2621 }
 0xa7f   :  { %v1169_v1 = vadd.f32 1.0, %v2622_v63 }
 0xa81   :  { %2623 = vrcp.f32 %v1169_v1 }
 0xa8e   :  { %v2624_v2 = vpop.eup %2623 }
 0xa8f   :  { %v1172_v3 = vsub.f32 1.0, %v2624_v2  ;;  %v1177_v10 = vmul.f32 %v2624_v2, %v1175_v7 }
 0xa91   :  { %v1173_v8 = vmul.f32 %v1172_v3, %v2817_v33  ;;  %v1333_v27 = vmul.f32 %v1172_v3, %v1090_v51 }
 0xa93   :  { %v1178_v12 = vadd.f32 %v1177_v10, %v1173_v8 }
 0xa95   :  { %1180 = vrot.lane.b32.xlu1 %v1178_v12, %s2644_s9 }
 0xb07   :  { %v1181_v9 = vpop.permute.xlu1 %1180 }
 0xb08   :  { %2522 = vmatmul.mubr.msk.f32.vlgmr.msra.gmra.mxu1 %vm215_vm2, %v1181_v9 }
 0xb09   :  { %2530 = vmatpush3.msra.mxu1 %v2743_v44  ;;  %2531 = vmatprep.mubr.msk.f32.mxu1 %vm2642_vm1, %v2641_v11 }
 0xb0a   :  { %2539 = vmatprep.subr.mxu1 %v2641_v11 }
 0xbc8   :  { %v1250_v14 = vpop.f32.mrf.mxu1 }
 0xbc9   :  { %v1254_v15 = vmul.f32 %v1250_v14, %v2758_v54  ;;  %1256 = vrot.lane.b32.xlu0 %v1250_v14, %s2644_s9 }
 0xbca   :  { %v2523_v17 = vpop.f32.mrf.mxu1 }
 0xbcb   :  { %2527 = vmatmul.mubr.msk.f32.vlgmr.msra.gmra.mxu0 %vm215_vm2, %v1254_v15 }
 0xbcc   :  { %2535 = vmatpush3.msra.mxu0 %v2796_v6  ;;  %2536 = vmatprep.mubr.msk.f32.mxu0 %vm2642_vm1, %v2641_v11 }
 0xbcd   :  { %2544 = vmatprep.subr.mxu0 %v2641_v11 }
 0xc3b   :  { %v1257_v19 = vpop.permute.xlu0 %1256 }
 0xc8b   :  { %v1328_v21 = vpop.f32.mrf.mxu0 }
 0xc8c   :  { %v1329_v23 = vadd.f32 %v1328_v21, %v1257_v19 }
 0xc8d   :  { %v2528_v24 = vpop.f32.mrf.mxu0 }
 0xc8e   :  { %v1332_v26 = vmax.f32 %v1329_v23, 0.0 }
 0xc90   :  { %v1334_v28 = vmul.f32 %v2624_v2, %v1332_v26 }
 0xc92   :  { %v1335_v54 = vadd.f32 %v1334_v28, %v1333_v27 }
 0xc94   :  { %1336 = vst.msk [vmem:[%s3013_s3 + $0x18] sm:$0xff] %vm215_vm2, %v1335_v54  ;;  %1419 = vrot.lane.b32.xlu1 %v1335_v54, %s2643_s0  ;;  %2532 = vmatmul.mubr.msk.f32.vlgmr.msra.gmra.mxu1 %vm215_vm2, %v1335_v54 }
 0xc95   :  { %2540 = vmatpush3.msra.mxu1 %v2822_v34  ;;  %2541 = vmatprep.mubr.msk.f32.mxu1 %vm2642_vm1, %v2641_v11 }
 0xc96   :  { %2549 = vmatprep.subr.mxu1 %v2641_v11 }
 0xd06   :  { %v1420_v39 = vpop.permute.xlu1 %1419 }
 0xd54   :  { %v1406_v43 = vpop.f32.mrf.mxu1 }
 0xd55   :  { %v1407_v29 = vadd.f32 %v1406_v43, %v2811_v20 }
 0xd56   :  { %v2533_v30 = vpop.f32.mrf.mxu1 }
 0xd57   :  { %v2357_v31 = vmul.f32 -2.0, %v1407_v29 }
 0xd59   :  { %v1412_v32 = vmul.f32 1.442695, %v2357_v31 }
 0xd5b   :  { %2625 = vpow2.f32 %v1412_v32 }
 0xd68   :  { %v2626_v35 = vpop.eup %2625 }
 0xd69   :  { %v1414_v36 = vadd.f32 1.0, %v2626_v35 }
 0xd6b   :  { %2627 = vrcp.f32 %v1414_v36 }
 0xd78   :  { %v2628_v37 = vpop.eup %2627 }
 0xd79   :  { %v1417_v38 = vsub.f32 1.0, %v2628_v37  ;;  %v1422_v42 = vmul.f32 %v2628_v37, %v1420_v39 }
 0xd7b   :  { %v1418_v41 = vmul.f32 %v1417_v38, %v2817_v33  ;;  %v1578_v55 = vmul.f32 %v1417_v38, %v1335_v54 }
 0xd7d   :  { %v1423_v45 = vadd.f32 %v1422_v42, %v1418_v41 }
 0xd7f   :  { %1425 = vrot.lane.b32.xlu0 %v1423_v45, %s2644_s9 }
 0xdf1   :  { %v1426_v46 = vpop.permute.xlu0 %1425 }
 0xdf2   :  { %2537 = vmatmul.mubr.msk.f32.vlgmr.msra.gmra.mxu0 %vm215_vm2, %v1426_v46 }
 0xdf3   :  { %2545 = vmatpush3.msra.mxu0 %v2743_v44  ;;  %2546 = vmatprep.mubr.msk.f32.mxu0 %vm2642_vm1, %v2641_v11 }
 0xdf4   :  { %2554 = vmatprep.subr.mxu0 %v2641_v11 }
 0xeb2   :  { %v1495_v20 = vpop.f32.mrf.mxu0 }
 0xeb3   :  { %v1499_v47 = vmul.f32 %v1495_v20, %v2771_v61  ;;  %1501 = vrot.lane.b32.xlu1 %v1495_v20, %s2644_s9 }
 0xeb4   :  { %v2538_v16 = vpop.f32.mrf.mxu0 }
 0xeb5   :  { %2542 = vmatmul.mubr.msk.f32.vlgmr.msra.gmra.mxu1 %vm215_vm2, %v1499_v47 }
 0xeb6   :  { %2550 = vmatpush3.msra.mxu1 %v2796_v6  ;;  %2551 = vmatprep.mubr.msk.f32.mxu1 %vm2642_vm1, %v2641_v11 }
 0xeb7   :  { %2559 = vmatprep.subr.mxu1 %v2641_v11 }
 0xf25   :  { %v1502_v48 = vpop.permute.xlu1 %1501 }
 0xf75   :  { %v1573_v49 = vpop.f32.mrf.mxu1 }
 0xf76   :  { %v1574_v50 = vadd.f32 %v1573_v49, %v1502_v48 }
 0xf77   :  { %v2543_v52 = vpop.f32.mrf.mxu1 }
 0xf78   :  { %v1577_v53 = vmax.f32 %v1574_v50, 0.0 }
 0xf7a   :  { %v1579_v40 = vmul.f32 %v2628_v37, %v1577_v53 }
 0xf7c   :  { %v1580_v61 = vadd.f32 %v1579_v40, %v1578_v55 }
 0xf7e   :  { %1581 = vst.msk [vmem:[%s3013_s3 + $0x20] sm:$0xff] %vm215_vm2, %v1580_v61  ;;  %1664 = vrot.lane.b32.xlu0 %v1580_v61, %s2643_s0  ;;  %2547 = vmatmul.mubr.msk.f32.vlgmr.msra.gmra.mxu0 %vm215_vm2, %v1580_v61 }
 0xf7f   :  { %2555 = vmatpush3.msra.mxu0 %v2822_v34  ;;  %2556 = vmatprep.mubr.msk.f32.mxu0 %vm2642_vm1, %v2641_v11 }
 0xf80   :  { %2564 = vmatprep.subr.mxu0 %v2641_v11 }
 0xff0   :  { %v1665_v1 = vpop.permute.xlu0 %1664 }
0x103e   :  { %v1651_v56 = vpop.f32.mrf.mxu0 }
0x103f   :  { %v1652_v57 = vadd.f32 %v1651_v56, %v2809_v18 }
0x1040   :  { %v2548_v51 = vpop.f32.mrf.mxu0 }
0x1041   :  { %v2361_v13 = vmul.f32 -2.0, %v1652_v57 }
0x1043   :  { %v1657_v58 = vmul.f32 1.442695, %v2361_v13 }
0x1045   :  { %2629 = vpow2.f32 %v1657_v58 }
0x1052   :  { %v2630_v59 = vpop.eup %2629 }
0x1053   :  { %v1659_v60 = vadd.f32 1.0, %v2630_v59 }
0x1055   :  { %2631 = vrcp.f32 %v1659_v60 }
0x1062   :  { %v2632_v62 = vpop.eup %2631 }
0x1063   :  { %v1662_v63 = vsub.f32 1.0, %v2632_v62  ;;  %v1667_v3 = vmul.f32 %v2632_v62, %v1665_v1 }
0x1065   :  { %v1663_v2 = vmul.f32 %v1662_v63, %v2817_v33  ;;  %v1823_v21 = vmul.f32 %v1662_v63, %v1580_v61 }
0x1067   :  { %v1668_v7 = vadd.f32 %v1667_v3, %v1663_v2 }
0x1069   :  { %1670 = vrot.lane.b32.xlu1 %v1668_v7, %s2644_s9 }
0x10db   :  { %v1671_v8 = vpop.permute.xlu1 %1670 }
0x10dc   :  { %2552 = vmatmul.mubr.msk.f32.vlgmr.msra.gmra.mxu1 %vm215_vm2, %v1671_v8 }
0x10dd   :  { %2560 = vmatpush3.msra.mxu1 %v2743_v44  ;;  %2561 = vmatprep.mubr.msk.f32.mxu1 %vm2642_vm1, %v2641_v11 }
0x10de   :  { %2569 = vmatprep.subr.mxu1 %v2641_v11 }
0x119c   :  { %v1740_v18 = vpop.f32.mrf.mxu1 }
0x119d   :  { %v1744_v10 = vmul.f32 %v1740_v18, %v2773_v0  ;;  %1746 = vrot.lane.b32.xlu0 %v1740_v18, %s2644_s9 }
0x119e   :  { %v2553_v12 = vpop.f32.mrf.mxu1 }
0x119f   :  { %2557 = vmatmul.mubr.msk.f32.vlgmr.msra.gmra.mxu0 %vm215_vm2, %v1744_v10 }
0x11a0   :  { %2565 = vmatpush3.msra.mxu0 %v2796_v6  ;;  %2566 = vmatprep.mubr.msk.f32.mxu0 %vm2642_vm1, %v2641_v11 }
0x11a1   :  { %2574 = vmatprep.subr.mxu0 %v2641_v11 }
0x120f   :  { %v1747_v9 = vpop.permute.xlu0 %1746 }
0x125f   :  { %v1818_v14 = vpop.f32.mrf.mxu0 }
0x1260   :  { %v1819_v15 = vadd.f32 %v1818_v14, %v1747_v9 }
0x1261   :  { %v2558_v17 = vpop.f32.mrf.mxu0 }
0x1262   :  { %v1822_v19 = vmax.f32 %v1819_v15, 0.0 }
0x1264   :  { %v1824_v23 = vmul.f32 %v2632_v62, %v1822_v19 }
0x1266   :  { %v1825_v0 = vadd.f32 %v1824_v23, %v1823_v21 }
0x1268   :  { %1826 = vst.msk [vmem:[%s3013_s3 + $0x28] sm:$0xff] %vm215_vm2, %v1825_v0  ;;  %1909 = vrot.lane.b32.xlu1 %v1825_v0, %s2643_s0  ;;  %2562 = vmatmul.mubr.msk.f32.vlgmr.msra.gmra.mxu1 %vm215_vm2, %v1825_v0 }
0x1269   :  { %2570 = vmatpush3.msra.mxu1 %v2822_v34  ;;  %2571 = vmatprep.mubr.msk.f32.mxu1 %vm2642_vm1, %v2641_v11 }
0x126a   :  { %2579 = vmatprep.subr.mxu1 %v2641_v11 }
0x12da   :  { %v1910_v32 = vpop.permute.xlu1 %1909 }
0x1328   :  { %v1896_v24 = vpop.f32.mrf.mxu1 }
0x1329   :  { %v1897_v26 = vadd.f32 %v1896_v24, %v2815_v25 }
0x132a   :  { %v2563_v27 = vpop.f32.mrf.mxu1 }
0x132b   :  { %v2365_v28 = vmul.f32 -2.0, %v1897_v26 }
0x132d   :  { %v1902_v54 = vmul.f32 1.442695, %v2365_v28 }
0x132f   :  { %2633 = vpow2.f32 %v1902_v54 }
0x133c   :  { %v2634_v43 = vpop.eup %2633 }
0x133d   :  { %v1904_v29 = vadd.f32 1.0, %v2634_v43 }
0x133f   :  { %2635 = vrcp.f32 %v1904_v29 }
0x134c   :  { %v2636_v30 = vpop.eup %2635 }
0x134d   :  { %v1907_v31 = vsub.f32 1.0, %v2636_v30  ;;  %v1912_v36 = vmul.f32 %v2636_v30, %v1910_v32 }
0x134f   :  { %v1908_v35 = vmul.f32 %v1907_v31, %v2817_v33  ;;  %v2068_v47 = vmul.f32 %v1907_v31, %v1825_v0 }
0x1351   :  { %v1913_v37 = vadd.f32 %v1912_v36, %v1908_v35 }
0x1353   :  { %1915 = vrot.lane.b32.xlu0 %v1913_v37, %s2644_s9 }
0x13c5   :  { %v1916_v38 = vpop.permute.xlu0 %1915 }
0x13c6   :  { %2567 = vmatmul.mubr.msk.f32.vlgmr.msra.gmra.mxu0 %vm215_vm2, %v1916_v38 }
0x13c7   :  { %2575 = vmatpush3.msra.mxu0 %v2743_v44  ;;  %2576 = vmatprep.mubr.msk.f32.mxu0 %vm2642_vm1, %v2641_v11 }
0x13c8   :  { %2584 = vmatprep.subr.mxu0 %v2641_v11 }
0x1486   :  { %v1985_v25 = vpop.f32.mrf.mxu0 }
0x1487   :  { %v1989_v39 = vmul.f32 %v1985_v25, %v2779_v4  ;;  %1991 = vrot.lane.b32.xlu1 %v1985_v25, %s2644_s9 }
0x1488   :  { %v2568_v41 = vpop.f32.mrf.mxu0 }
0x1489   :  { %2572 = vmatmul.mubr.msk.f32.vlgmr.msra.gmra.mxu1 %vm215_vm2, %v1989_v39 }
0x148a   :  { %2580 = vmatpush3.msra.mxu1 %v2796_v6  ;;  %2581 = vmatprep.mubr.msk.f32.mxu1 %vm2642_vm1, %v2641_v11 }
0x14f9   :  { %v1992_v42 = vpop.permute.xlu1 %1991 }
0x1549   :  { %v2063_v44 = vpop.f32.mrf.mxu1 }
0x154a   :  { %v2064_v45 = vadd.f32 %v2063_v44, %v1992_v42 }
0x154b   :  { %v2573_v46 = vpop.f32.mrf.mxu1 }
0x154c   :  { %v2067_v20 = vmax.f32 %v2064_v45, 0.0 }
0x154e   :  { %v2069_v16 = vmul.f32 %v2636_v30, %v2067_v20 }
0x1550   :  { %v2070_v48 = vadd.f32 %v2069_v16, %v2068_v47 }
0x1552   :  { %2071 = vst.msk [vmem:[%s3013_s3 + $0x30] sm:$0xff] %vm215_vm2, %v2070_v48  ;;  %2154 = vrot.lane.b32.xlu0 %v2070_v48, %s2643_s0  ;;  %2577 = vmatmul.mubr.msk.f32.vlgmr.msra.gmra.mxu0 %vm215_vm2, %v2070_v48 }
0x1553   :  { %2585 = vmatpush3.msra.mxu0 %v2822_v34  ;;  %2586 = vmatprep.mubr.msk.f32.mxu0 %vm2642_vm1, %v2641_v11 }
0x15c4   :  { %v2155_v56 = vpop.permute.xlu0 %2154 }
0x1612   :  { %v2141_v4 = vpop.f32.mrf.mxu0 }
0x1613   :  { %v2142_v6 = vadd.f32 %v2141_v4, %v2813_v22 }
0x1614   :  { %v2578_v49 = vpop.f32.mrf.mxu0 }
0x1615   :  { %v2369_v50 = vmul.f32 -2.0, %v2142_v6 }
0x1617   :  { %v2147_v52 = vmul.f32 1.442695, %v2369_v50 }
0x1619   :  { %2637 = vpow2.f32 %v2147_v52 }
0x1626   :  { %v2638_v53 = vpop.eup %2637 }
0x1627   :  { %v2149_v55 = vadd.f32 1.0, %v2638_v53 }
0x1629   :  { %2639 = vrcp.f32 %v2149_v55 }
0x1636   :  { %v2640_v40 = vpop.eup %2639 }
0x1637   :  { %v2152_v61 = vsub.f32 1.0, %v2640_v40  ;;  %v2157_v51 = vmul.f32 %v2640_v40, %v2155_v56 }
0x1639   :  { %v2153_v57 = vmul.f32 %v2152_v61, %v2817_v33  ;;  %v2313_v1 = vmul.f32 %v2152_v61, %v2070_v48 }
0x163b   :  { %v2158_v34 = vadd.f32 %v2157_v51, %v2153_v57 }
0x163d   :  { %2160 = vrot.lane.b32.xlu1 %v2158_v34, %s2644_s9 }
0x16af   :  { %v2161_v11 = vpop.permute.xlu1 %2160 }
0x16b0   :  { %2582 = vmatmul.mubr.msk.f32.vlgmr.msra.gmra.mxu1 %vm215_vm2, %v2161_v11 }
0x1770   :  { %v2230_v22 = vpop.f32.mrf.mxu1 }
0x1771   :  { %v2234_v13 = vmul.f32 %v2230_v22, %v2781_v5  ;;  %2236 = vrot.lane.b32.xlu0 %v2230_v22, %s2644_s9 }
0x1772   :  { %v2583_v58 = vpop.f32.mrf.mxu1 }
0x1773   :  { %2587 = vmatmul.mubr.msk.f32.vlgmr.msra.gmra.mxu0 %vm215_vm2, %v2234_v13 }
0x17e3   :  { %v2237_v59 = vpop.permute.xlu0 %2236 }
0x1833   :  { %v2308_v60 = vpop.f32.mrf.mxu0 }
0x1834   :  { %v2309_v62 = vadd.f32 %v2308_v60, %v2237_v59 }
0x1835   :  { %v2588_v63 = vpop.f32.mrf.mxu0 }
0x1836   :  { %v2312_v33 = vmax.f32 %v2309_v62, 0.0 }
0x1838   :  { %v2314_v2 = vmul.f32 %v2640_v40, %v2312_v33 }
0x183a   :  { %v2315_v3 = vadd.f32 %v2314_v2, %v2313_v1 }
0x183c   :  { %2316 = vst.msk [vmem:[%s3013_s3 + $0x38] sm:$0xff] %vm215_vm2, %v2315_v3 }

</bundles_post_ra>
